<compile_context>
chip_gen: v6e
topology: v6e:2x2x1
jax: 0.10.0
libtpu: 0.0.40
codegen_flags: <defaults>
</compile_context>

<pallas_src>
import jax
import jax.numpy as jnp
from jax.experimental import pallas as pl
from jax.experimental.pallas import tpu as pltpu


# ----------------------------------------------------------------------------
# Fused Pallas kernel: all LSTM layers + last-step Linear
# ----------------------------------------------------------------------------
def make_deeplog_kernel(num_layers, T, B, H):
    """Kernel args (in order):
         x_ref (T*B, E)   -- time-major flattened, row index = t*B + b
         [w_ih (in,4H), w_hh (H,4H), bias (1,4H)] * num_layers   (gates i,f,g,o)
         fc_w (H,V), fc_b (1,V),
         out_ref (B,V)
    """

    def kernel(*refs):
        x_ref = refs[0]
        idx = 1
        layer_refs = []
        for _ in range(num_layers):
            layer_refs.append((refs[idx], refs[idx + 1], refs[idx + 2]))
            idx += 3
        fc_w_ref, fc_b_ref, out_ref = refs[idx], refs[idx + 1], refs[idx + 2]

        x_all = x_ref[...]                           # (T*B, E) dense slab

        h = None
        for layer in range(num_layers):
            w_ih = layer_refs[layer][0][...]         # (in_dim, 4H)
            w_hh = layer_refs[layer][1][...]         # (H, 4H)
            bias = layer_refs[layer][2][...]         # (1, 4H)

            # Hoisted input-to-hidden matmul + bias: ONE (T*B, in_dim, 4H)
            # matmul per layer instead of T tiny (B, in_dim) ones, and the
            # bias broadcast happens once instead of every timestep.
            xw = (jnp.dot(x_all, w_ih, preferred_element_type=jnp.float32)
                  + bias)                            # (T*B, 4H)

            h = jnp.zeros((B, H), jnp.float32)
            c = jnp.zeros((B, H), jnp.float32)
            last_layer = layer == num_layers - 1
            outs = []
            for t in range(T):
                # Per-step critical path: one (B,H)x(H,4H) matmul + add.
                gates = (xw[t * B:(t + 1) * B, :]
                         + jnp.dot(h, w_hh,
                                   preferred_element_type=jnp.float32))  # (B,4H)

                # Full-width activations (2 wide EUP issues), then static lane
                # slices of the activated values (XLU, off the EUP path).
                sg = jax.nn.sigmoid(gates)           # (B, 4H)
                th = jnp.tanh(gates)                 # (B, 4H)
                i_g = sg[:, 0 * H:1 * H]
                f_g = sg[:, 1 * H:2 * H]
                g_g = th[:, 2 * H:3 * H]
                o_g = sg[:, 3 * H:4 * H]

                c = f_g * c + i_g * g_g
                h = o_g * jnp.tanh(c)
                if not last_layer:
                    outs.append(h)                   # stays in vregs/VMEM
            if not last_layer:
                # (T*B, H) slab feeding the next layer's hoisted matmul.
                x_all = jnp.concatenate(outs, axis=0)

        # Last-step Linear fused in-kernel: only (B, V) goes back to HBM.
        out_ref[...] = (jnp.dot(h, fc_w_ref[...],
                                preferred_element_type=jnp.float32)
                        + fc_b_ref[...]).astype(out_ref.dtype)

    return kernel


def deeplog_pallas(x_flat, lstm_params, fc_w, fc_b, T, B):
    """x_flat: (T*B, E) time-major flattened embedded sequence. Returns (B, V)."""
    TB, E = x_flat.shape
    H = lstm_params[0][1].shape[0]
    V = fc_w.shape[-1]
    num_layers = len(lstm_params)

    in_specs = [pl.BlockSpec((TB, E), lambda i: (0, 0))]
    flat_inputs = [x_flat]
    for (w_ih, w_hh, bias) in lstm_params:
        in_dim = w_ih.shape[0]
        in_specs += [
            pl.BlockSpec((in_dim, 4 * H), lambda i: (0, 0)),
            pl.BlockSpec((H, 4 * H), lambda i: (0, 0)),
            pl.BlockSpec((1, 4 * H), lambda i: (0, 0)),
        ]
        flat_inputs += [w_ih, w_hh, bias]
    in_specs += [
        pl.BlockSpec((H, V), lambda i: (0, 0)),
        pl.BlockSpec((1, V), lambda i: (0, 0)),
    ]
    flat_inputs += [fc_w, fc_b]

    kernel = make_deeplog_kernel(num_layers, T, B, H)
    return pl.pallas_call(
        kernel,
        out_shape=jax.ShapeDtypeStruct((B, V), jnp.float32),
        grid_spec=pltpu.PrefetchScalarGridSpec(
            num_scalar_prefetch=0,
            grid=(1,),                      # single invocation; recurrence in-kernel
            in_specs=in_specs,
            out_specs=pl.BlockSpec((B, V), lambda i: (0, 0)),
        ),
        compiler_params=pltpu.CompilerParams(
            dimension_semantics=("arbitrary",)),
    )(*flat_inputs)


# ----------------------------------------------------------------------------
# Forward pass (embedding gather as JAX glue, everything else fused in Pallas)
# ----------------------------------------------------------------------------
@jax.jit
def deeplog_forward(tokens, params):
    """Equivalent of Deeplog.forward(features, device) with features[0] == tokens."""
    B, T = tokens.shape
    # Gather directly into time-major flattened order (row = t*B + b): avoids a
    # separate (B,T,E)->(T,B,E) transpose and gives the kernel a dense slab.
    flat_tok = jnp.transpose(tokens, (1, 0)).reshape(-1)          # (T*B,)
    x = jnp.take(params["embedding"], flat_tok, axis=0).astype(jnp.float32)  # (T*B, E)
    return deeplog_pallas(x, params["lstm"], params["fc_w"], params["fc_b"], T, B)


# ----------------------------------------------------------------------------
# Pure-JAX reference (for correctness check) — same packed-weight layout
# ----------------------------------------------------------------------------
def deeplog_ref(tokens, params):
    emb = jnp.take(params["embedding"], tokens, axis=0)
    x = jnp.transpose(emb, (1, 0, 2)).astype(jnp.float32)         # (T, B, E)
    for (w_ih, w_hh, bias) in params["lstm"]:
        T, B, _ = x.shape
        H = w_hh.shape[0]
        h = jnp.zeros((B, H), jnp.float32)
        c = jnp.zeros((B, H), jnp.float32)
        ys = []
        for t in range(T):
            gates = x[t] @ w_ih + h @ w_hh + bias
            i = jax.nn.sigmoid(gates[:, 0:H])
            f = jax.nn.sigmoid(gates[:, H:2 * H])
            g = jnp.tanh(gates[:, 2 * H:3 * H])
            o = jax.nn.sigmoid(gates[:, 3 * H:4 * H])
            c = f * c + i * g
            h = o * jnp.tanh(c)
            ys.append(h)
        x = jnp.stack(ys)
    return x[-1] @ params["fc_w"] + params["fc_b"]


# ----------------------------------------------------------------------------
# Deterministic parameter init (mirrors nn.Module __init__ shapes; gates packed)
# ----------------------------------------------------------------------------
def init_params(key, vocab_size, embedding_dim, hidden_size, num_layers):
    keys = jax.random.split(key, 1 + 4 * num_layers + 2)
    k_iter = iter(keys)

    # nn.Embedding(vocab, E) with torch.nn.init.uniform_ -> U[0, 1)
    embedding = jax.random.uniform(next(k_iter), (vocab_size, embedding_dim),
                                   dtype=jnp.float32)

    # nn.LSTM default init: U(-1/sqrt(H), 1/sqrt(H)); gates packed (i, f, g, o)
    bound = 1.0 / jnp.sqrt(jnp.float32(hidden_size))
    lstm = []
    for layer in range(num_layers):
        in_dim = embedding_dim if layer == 0 else hidden_size
        w_ih = jax.random.uniform(next(k_iter), (in_dim, 4 * hidden_size),
                                  minval=-bound, maxval=bound, dtype=jnp.float32)
        w_hh = jax.random.uniform(next(k_iter), (hidden_size, 4 * hidden_size),
                                  minval=-bound, maxval=bound, dtype=jnp.float32)
        b_ih = jax.random.uniform(next(k_iter), (1, 4 * hidden_size),
                                  minval=-bound, maxval=bound, dtype=jnp.float32)
        b_hh = jax.random.uniform(next(k_iter), (1, 4 * hidden_size),
                                  minval=-bound, maxval=bound, dtype=jnp.float32)
        lstm.append((w_ih, w_hh, b_ih + b_hh))

    # nn.Linear(H, vocab) default init: U(-1/sqrt(H), 1/sqrt(H))
    fc_w = jax.random.uniform(next(k_iter), (hidden_size, vocab_size),
                              minval=-bound, maxval=bound, dtype=jnp.float32)
    fc_b = jax.random.uniform(next(k_iter), (1, vocab_size),
                              minval=-bound, maxval=bound, dtype=jnp.float32)

    return {"embedding": embedding, "lstm": lstm, "fc_w": fc_w, "fc_b": fc_b}


if __name__ == "__main__":
    # Small shapes consistent with the module's forward.
    batch, seq_len = 2, 8
    vocab_size, embedding_dim, hidden_size, num_layers = 16, 32, 32, 2

    key = jax.random.PRNGKey(0)
    k_tok, k_params = jax.random.split(key)

    tokens = jax.random.randint(k_tok, (batch, seq_len), 0, vocab_size,
                                dtype=jnp.int32)
    features = (tokens,)  # Deeplog.forward uses features[0]
    params = init_params(k_params, vocab_size, embedding_dim, hidden_size,
                         num_layers)

    out = deeplog_forward(features[0], params)
    out = jax.block_until_ready(out)

    ref = deeplog_ref(features[0], params)
    assert out.shape == (batch, vocab_size)
    assert jnp.allclose(out, ref, atol=1e-5, rtol=1e-5), "mismatch vs reference"

    print("KERNEL_OK")
</pallas_src>

<mosaic_0001>
module attributes {stable_mosaic.version = 11 : i64} {
  func.func @kernel(%arg0: i32, %arg1: memref<16x32xf32, #tpu.memory_space<vmem>>, %arg2: memref<32x128xf32, #tpu.memory_space<vmem>>, %arg3: memref<32x128xf32, #tpu.memory_space<vmem>>, %arg4: memref<1x128xf32, #tpu.memory_space<vmem>>, %arg5: memref<32x128xf32, #tpu.memory_space<vmem>>, %arg6: memref<32x128xf32, #tpu.memory_space<vmem>>, %arg7: memref<1x128xf32, #tpu.memory_space<vmem>>, %arg8: memref<32x16xf32, #tpu.memory_space<vmem>>, %arg9: memref<1x16xf32, #tpu.memory_space<vmem>>, %arg10: memref<2x16xf32, #tpu.memory_space<vmem>>) attributes {dimension_semantics = [#tpu.dimension_semantics<arbitrary>], iteration_bounds = array<i64: 1>, scalar_prefetch = 0 : i64, scratch_operands = 0 : i64, tpu.core_type = #tpu.core_type<tc>, window_params = [{pipeline_mode = #tpu.pipeline_mode<synchronous>, transform_indices = @transform_0, window_bounds = array<i64: 16, 32>}, {pipeline_mode = #tpu.pipeline_mode<synchronous>, transform_indices = @transform_1, window_bounds = array<i64: 32, 128>}, {pipeline_mode = #tpu.pipeline_mode<synchronous>, transform_indices = @transform_2, window_bounds = array<i64: 32, 128>}, {pipeline_mode = #tpu.pipeline_mode<synchronous>, transform_indices = @transform_3, window_bounds = array<i64: 1, 128>}, {pipeline_mode = #tpu.pipeline_mode<synchronous>, transform_indices = @transform_4, window_bounds = array<i64: 32, 128>}, {pipeline_mode = #tpu.pipeline_mode<synchronous>, transform_indices = @transform_5, window_bounds = array<i64: 32, 128>}, {pipeline_mode = #tpu.pipeline_mode<synchronous>, transform_indices = @transform_6, window_bounds = array<i64: 1, 128>}, {pipeline_mode = #tpu.pipeline_mode<synchronous>, transform_indices = @transform_7, window_bounds = array<i64: 32, 16>}, {pipeline_mode = #tpu.pipeline_mode<synchronous>, transform_indices = @transform_8, window_bounds = array<i64: 1, 16>}, {pipeline_mode = #tpu.pipeline_mode<synchronous>, transform_indices = @transform_9, window_bounds = array<i64: 2, 16>}]} {
    %c0 = arith.constant 0 : index
    %c0_0 = arith.constant 0 : index
    %0 = vector.load %arg1[%c0, %c0_0] : memref<16x32xf32, #tpu.memory_space<vmem>>, vector<16x32xf32>
    %c0_1 = arith.constant 0 : index
    %c0_2 = arith.constant 0 : index
    %1 = vector.load %arg2[%c0_1, %c0_2] : memref<32x128xf32, #tpu.memory_space<vmem>>, vector<32x128xf32>
    %c0_3 = arith.constant 0 : index
    %c0_4 = arith.constant 0 : index
    %2 = vector.load %arg3[%c0_3, %c0_4] : memref<32x128xf32, #tpu.memory_space<vmem>>, vector<32x128xf32>
    %c0_5 = arith.constant 0 : index
    %c0_6 = arith.constant 0 : index
    %3 = vector.load %arg4[%c0_5, %c0_6] : memref<1x128xf32, #tpu.memory_space<vmem>>, vector<1x128xf32>
    %cst = arith.constant dense<0.000000e+00> : vector<16x128xf32>
    %4 = tpu.matmul %0, %1, %cst {dimension_numbers = #tpu.dot_dimension_numbers<[1], [0], [0], [1], [0, 0, 1, 1], [], []>} : vector<16x32xf32>, vector<32x128xf32>, vector<16x128xf32> -> vector<16x128xf32>
    %5 = vector.broadcast %3 : vector<1x128xf32> to vector<16x128xf32>
    %6 = arith.addf %4, %5 : vector<16x128xf32>
    %cst_7 = arith.constant 0.000000e+00 : f32
    %7 = vector.broadcast %cst_7 : f32 to vector<2x32xf32>
    %cst_8 = arith.constant 0.000000e+00 : f32
    %8 = vector.broadcast %cst_8 : f32 to vector<2x32xf32>
    %9 = vector.extract_strided_slice %6 {offsets = [0, 0], sizes = [2, 128], strides = [1, 1]} : vector<16x128xf32> to vector<2x128xf32>
    %cst_9 = arith.constant dense<0.000000e+00> : vector<2x128xf32>
    %10 = tpu.matmul %7, %2, %cst_9 {dimension_numbers = #tpu.dot_dimension_numbers<[1], [0], [0], [1], [0, 0, 1, 1], [], []>} : vector<2x32xf32>, vector<32x128xf32>, vector<2x128xf32> -> vector<2x128xf32>
    %11 = arith.addf %9, %10 : vector<2x128xf32>
    %12 = arith.negf %11 : vector<2x128xf32>
    %13 = math.exp %12 : vector<2x128xf32>
    %cst_10 = arith.constant 1.000000e+00 : f32
    %14 = vector.broadcast %cst_10 : f32 to vector<2x128xf32>
    %15 = arith.addf %14, %13 : vector<2x128xf32>
    %16 = arith.divf %14, %15 : vector<2x128xf32>
    %17 = math.tanh %11 : vector<2x128xf32>
    %18 = vector.extract_strided_slice %16 {offsets = [0, 0], sizes = [2, 32], strides = [1, 1]} : vector<2x128xf32> to vector<2x32xf32>
    %19 = vector.extract_strided_slice %16 {offsets = [0, 32], sizes = [2, 32], strides = [1, 1]} : vector<2x128xf32> to vector<2x32xf32>
    %20 = vector.extract_strided_slice %17 {offsets = [0, 64], sizes = [2, 32], strides = [1, 1]} : vector<2x128xf32> to vector<2x32xf32>
    %21 = vector.extract_strided_slice %16 {offsets = [0, 96], sizes = [2, 32], strides = [1, 1]} : vector<2x128xf32> to vector<2x32xf32>
    %22 = arith.mulf %19, %8 : vector<2x32xf32>
    %23 = arith.mulf %18, %20 : vector<2x32xf32>
    %24 = arith.addf %22, %23 : vector<2x32xf32>
    %25 = math.tanh %24 : vector<2x32xf32>
    %26 = arith.mulf %21, %25 : vector<2x32xf32>
    %27 = vector.extract_strided_slice %6 {offsets = [2, 0], sizes = [2, 128], strides = [1, 1]} : vector<16x128xf32> to vector<2x128xf32>
    %cst_11 = arith.constant dense<0.000000e+00> : vector<2x128xf32>
    %28 = tpu.matmul %26, %2, %cst_11 {dimension_numbers = #tpu.dot_dimension_numbers<[1], [0], [0], [1], [0, 0, 1, 1], [], []>} : vector<2x32xf32>, vector<32x128xf32>, vector<2x128xf32> -> vector<2x128xf32>
    %29 = arith.addf %27, %28 : vector<2x128xf32>
    %30 = arith.negf %29 : vector<2x128xf32>
    %31 = math.exp %30 : vector<2x128xf32>
    %cst_12 = arith.constant 1.000000e+00 : f32
    %32 = vector.broadcast %cst_12 : f32 to vector<2x128xf32>
    %33 = arith.addf %32, %31 : vector<2x128xf32>
    %34 = arith.divf %32, %33 : vector<2x128xf32>
    %35 = math.tanh %29 : vector<2x128xf32>
    %36 = vector.extract_strided_slice %34 {offsets = [0, 0], sizes = [2, 32], strides = [1, 1]} : vector<2x128xf32> to vector<2x32xf32>
    %37 = vector.extract_strided_slice %34 {offsets = [0, 32], sizes = [2, 32], strides = [1, 1]} : vector<2x128xf32> to vector<2x32xf32>
    %38 = vector.extract_strided_slice %35 {offsets = [0, 64], sizes = [2, 32], strides = [1, 1]} : vector<2x128xf32> to vector<2x32xf32>
    %39 = vector.extract_strided_slice %34 {offsets = [0, 96], sizes = [2, 32], strides = [1, 1]} : vector<2x128xf32> to vector<2x32xf32>
    %40 = arith.mulf %37, %24 : vector<2x32xf32>
    %41 = arith.mulf %36, %38 : vector<2x32xf32>
    %42 = arith.addf %40, %41 : vector<2x32xf32>
    %43 = math.tanh %42 : vector<2x32xf32>
    %44 = arith.mulf %39, %43 : vector<2x32xf32>
    %45 = vector.extract_strided_slice %6 {offsets = [4, 0], sizes = [2, 128], strides = [1, 1]} : vector<16x128xf32> to vector<2x128xf32>
    %cst_13 = arith.constant dense<0.000000e+00> : vector<2x128xf32>
    %46 = tpu.matmul %44, %2, %cst_13 {dimension_numbers = #tpu.dot_dimension_numbers<[1], [0], [0], [1], [0, 0, 1, 1], [], []>} : vector<2x32xf32>, vector<32x128xf32>, vector<2x128xf32> -> vector<2x128xf32>
    %47 = arith.addf %45, %46 : vector<2x128xf32>
    %48 = arith.negf %47 : vector<2x128xf32>
    %49 = math.exp %48 : vector<2x128xf32>
    %cst_14 = arith.constant 1.000000e+00 : f32
    %50 = vector.broadcast %cst_14 : f32 to vector<2x128xf32>
    %51 = arith.addf %50, %49 : vector<2x128xf32>
    %52 = arith.divf %50, %51 : vector<2x128xf32>
    %53 = math.tanh %47 : vector<2x128xf32>
    %54 = vector.extract_strided_slice %52 {offsets = [0, 0], sizes = [2, 32], strides = [1, 1]} : vector<2x128xf32> to vector<2x32xf32>
    %55 = vector.extract_strided_slice %52 {offsets = [0, 32], sizes = [2, 32], strides = [1, 1]} : vector<2x128xf32> to vector<2x32xf32>
    %56 = vector.extract_strided_slice %53 {offsets = [0, 64], sizes = [2, 32], strides = [1, 1]} : vector<2x128xf32> to vector<2x32xf32>
    %57 = vector.extract_strided_slice %52 {offsets = [0, 96], sizes = [2, 32], strides = [1, 1]} : vector<2x128xf32> to vector<2x32xf32>
    %58 = arith.mulf %55, %42 : vector<2x32xf32>
    %59 = arith.mulf %54, %56 : vector<2x32xf32>
    %60 = arith.addf %58, %59 : vector<2x32xf32>
    %61 = math.tanh %60 : vector<2x32xf32>
    %62 = arith.mulf %57, %61 : vector<2x32xf32>
    %63 = vector.extract_strided_slice %6 {offsets = [6, 0], sizes = [2, 128], strides = [1, 1]} : vector<16x128xf32> to vector<2x128xf32>
    %cst_15 = arith.constant dense<0.000000e+00> : vector<2x128xf32>
    %64 = tpu.matmul %62, %2, %cst_15 {dimension_numbers = #tpu.dot_dimension_numbers<[1], [0], [0], [1], [0, 0, 1, 1], [], []>} : vector<2x32xf32>, vector<32x128xf32>, vector<2x128xf32> -> vector<2x128xf32>
    %65 = arith.addf %63, %64 : vector<2x128xf32>
    %66 = arith.negf %65 : vector<2x128xf32>
    %67 = math.exp %66 : vector<2x128xf32>
    %cst_16 = arith.constant 1.000000e+00 : f32
    %68 = vector.broadcast %cst_16 : f32 to vector<2x128xf32>
    %69 = arith.addf %68, %67 : vector<2x128xf32>
    %70 = arith.divf %68, %69 : vector<2x128xf32>
    %71 = math.tanh %65 : vector<2x128xf32>
    %72 = vector.extract_strided_slice %70 {offsets = [0, 0], sizes = [2, 32], strides = [1, 1]} : vector<2x128xf32> to vector<2x32xf32>
    %73 = vector.extract_strided_slice %70 {offsets = [0, 32], sizes = [2, 32], strides = [1, 1]} : vector<2x128xf32> to vector<2x32xf32>
    %74 = vector.extract_strided_slice %71 {offsets = [0, 64], sizes = [2, 32], strides = [1, 1]} : vector<2x128xf32> to vector<2x32xf32>
    %75 = vector.extract_strided_slice %70 {offsets = [0, 96], sizes = [2, 32], strides = [1, 1]} : vector<2x128xf32> to vector<2x32xf32>
    %76 = arith.mulf %73, %60 : vector<2x32xf32>
    %77 = arith.mulf %72, %74 : vector<2x32xf32>
    %78 = arith.addf %76, %77 : vector<2x32xf32>
    %79 = math.tanh %78 : vector<2x32xf32>
    %80 = arith.mulf %75, %79 : vector<2x32xf32>
    %81 = vector.extract_strided_slice %6 {offsets = [8, 0], sizes = [2, 128], strides = [1, 1]} : vector<16x128xf32> to vector<2x128xf32>
    %cst_17 = arith.constant dense<0.000000e+00> : vector<2x128xf32>
    %82 = tpu.matmul %80, %2, %cst_17 {dimension_numbers = #tpu.dot_dimension_numbers<[1], [0], [0], [1], [0, 0, 1, 1], [], []>} : vector<2x32xf32>, vector<32x128xf32>, vector<2x128xf32> -> vector<2x128xf32>
    %83 = arith.addf %81, %82 : vector<2x128xf32>
    %84 = arith.negf %83 : vector<2x128xf32>
    %85 = math.exp %84 : vector<2x128xf32>
    %cst_18 = arith.constant 1.000000e+00 : f32
    %86 = vector.broadcast %cst_18 : f32 to vector<2x128xf32>
    %87 = arith.addf %86, %85 : vector<2x128xf32>
    %88 = arith.divf %86, %87 : vector<2x128xf32>
    %89 = math.tanh %83 : vector<2x128xf32>
    %90 = vector.extract_strided_slice %88 {offsets = [0, 0], sizes = [2, 32], strides = [1, 1]} : vector<2x128xf32> to vector<2x32xf32>
    %91 = vector.extract_strided_slice %88 {offsets = [0, 32], sizes = [2, 32], strides = [1, 1]} : vector<2x128xf32> to vector<2x32xf32>
    %92 = vector.extract_strided_slice %89 {offsets = [0, 64], sizes = [2, 32], strides = [1, 1]} : vector<2x128xf32> to vector<2x32xf32>
    %93 = vector.extract_strided_slice %88 {offsets = [0, 96], sizes = [2, 32], strides = [1, 1]} : vector<2x128xf32> to vector<2x32xf32>
    %94 = arith.mulf %91, %78 : vector<2x32xf32>
    %95 = arith.mulf %90, %92 : vector<2x32xf32>
    %96 = arith.addf %94, %95 : vector<2x32xf32>
    %97 = math.tanh %96 : vector<2x32xf32>
    %98 = arith.mulf %93, %97 : vector<2x32xf32>
    %99 = vector.extract_strided_slice %6 {offsets = [10, 0], sizes = [2, 128], strides = [1, 1]} : vector<16x128xf32> to vector<2x128xf32>
    %cst_19 = arith.constant dense<0.000000e+00> : vector<2x128xf32>
    %100 = tpu.matmul %98, %2, %cst_19 {dimension_numbers = #tpu.dot_dimension_numbers<[1], [0], [0], [1], [0, 0, 1, 1], [], []>} : vector<2x32xf32>, vector<32x128xf32>, vector<2x128xf32> -> vector<2x128xf32>
    %101 = arith.addf %99, %100 : vector<2x128xf32>
    %102 = arith.negf %101 : vector<2x128xf32>
    %103 = math.exp %102 : vector<2x128xf32>
    %cst_20 = arith.constant 1.000000e+00 : f32
    %104 = vector.broadcast %cst_20 : f32 to vector<2x128xf32>
    %105 = arith.addf %104, %103 : vector<2x128xf32>
    %106 = arith.divf %104, %105 : vector<2x128xf32>
    %107 = math.tanh %101 : vector<2x128xf32>
    %108 = vector.extract_strided_slice %106 {offsets = [0, 0], sizes = [2, 32], strides = [1, 1]} : vector<2x128xf32> to vector<2x32xf32>
    %109 = vector.extract_strided_slice %106 {offsets = [0, 32], sizes = [2, 32], strides = [1, 1]} : vector<2x128xf32> to vector<2x32xf32>
    %110 = vector.extract_strided_slice %107 {offsets = [0, 64], sizes = [2, 32], strides = [1, 1]} : vector<2x128xf32> to vector<2x32xf32>
    %111 = vector.extract_strided_slice %106 {offsets = [0, 96], sizes = [2, 32], strides = [1, 1]} : vector<2x128xf32> to vector<2x32xf32>
    %112 = arith.mulf %109, %96 : vector<2x32xf32>
    %113 = arith.mulf %108, %110 : vector<2x32xf32>
    %114 = arith.addf %112, %113 : vector<2x32xf32>
    %115 = math.tanh %114 : vector<2x32xf32>
    %116 = arith.mulf %111, %115 : vector<2x32xf32>
    %117 = vector.extract_strided_slice %6 {offsets = [12, 0], sizes = [2, 128], strides = [1, 1]} : vector<16x128xf32> to vector<2x128xf32>
    %cst_21 = arith.constant dense<0.000000e+00> : vector<2x128xf32>
    %118 = tpu.matmul %116, %2, %cst_21 {dimension_numbers = #tpu.dot_dimension_numbers<[1], [0], [0], [1], [0, 0, 1, 1], [], []>} : vector<2x32xf32>, vector<32x128xf32>, vector<2x128xf32> -> vector<2x128xf32>
    %119 = arith.addf %117, %118 : vector<2x128xf32>
    %120 = arith.negf %119 : vector<2x128xf32>
    %121 = math.exp %120 : vector<2x128xf32>
    %cst_22 = arith.constant 1.000000e+00 : f32
    %122 = vector.broadcast %cst_22 : f32 to vector<2x128xf32>
    %123 = arith.addf %122, %121 : vector<2x128xf32>
    %124 = arith.divf %122, %123 : vector<2x128xf32>
    %125 = math.tanh %119 : vector<2x128xf32>
    %126 = vector.extract_strided_slice %124 {offsets = [0, 0], sizes = [2, 32], strides = [1, 1]} : vector<2x128xf32> to vector<2x32xf32>
    %127 = vector.extract_strided_slice %124 {offsets = [0, 32], sizes = [2, 32], strides = [1, 1]} : vector<2x128xf32> to vector<2x32xf32>
    %128 = vector.extract_strided_slice %125 {offsets = [0, 64], sizes = [2, 32], strides = [1, 1]} : vector<2x128xf32> to vector<2x32xf32>
    %129 = vector.extract_strided_slice %124 {offsets = [0, 96], sizes = [2, 32], strides = [1, 1]} : vector<2x128xf32> to vector<2x32xf32>
    %130 = arith.mulf %127, %114 : vector<2x32xf32>
    %131 = arith.mulf %126, %128 : vector<2x32xf32>
    %132 = arith.addf %130, %131 : vector<2x32xf32>
    %133 = math.tanh %132 : vector<2x32xf32>
    %134 = arith.mulf %129, %133 : vector<2x32xf32>
    %135 = vector.extract_strided_slice %6 {offsets = [14, 0], sizes = [2, 128], strides = [1, 1]} : vector<16x128xf32> to vector<2x128xf32>
    %cst_23 = arith.constant dense<0.000000e+00> : vector<2x128xf32>
    %136 = tpu.matmul %134, %2, %cst_23 {dimension_numbers = #tpu.dot_dimension_numbers<[1], [0], [0], [1], [0, 0, 1, 1], [], []>} : vector<2x32xf32>, vector<32x128xf32>, vector<2x128xf32> -> vector<2x128xf32>
    %137 = arith.addf %135, %136 : vector<2x128xf32>
    %138 = arith.negf %137 : vector<2x128xf32>
    %139 = math.exp %138 : vector<2x128xf32>
    %cst_24 = arith.constant 1.000000e+00 : f32
    %140 = vector.broadcast %cst_24 : f32 to vector<2x128xf32>
    %141 = arith.addf %140, %139 : vector<2x128xf32>
    %142 = arith.divf %140, %141 : vector<2x128xf32>
    %143 = math.tanh %137 : vector<2x128xf32>
    %144 = vector.extract_strided_slice %142 {offsets = [0, 0], sizes = [2, 32], strides = [1, 1]} : vector<2x128xf32> to vector<2x32xf32>
    %145 = vector.extract_strided_slice %142 {offsets = [0, 32], sizes = [2, 32], strides = [1, 1]} : vector<2x128xf32> to vector<2x32xf32>
    %146 = vector.extract_strided_slice %143 {offsets = [0, 64], sizes = [2, 32], strides = [1, 1]} : vector<2x128xf32> to vector<2x32xf32>
    %147 = vector.extract_strided_slice %142 {offsets = [0, 96], sizes = [2, 32], strides = [1, 1]} : vector<2x128xf32> to vector<2x32xf32>
    %148 = arith.mulf %145, %132 : vector<2x32xf32>
    %149 = arith.mulf %144, %146 : vector<2x32xf32>
    %150 = arith.addf %148, %149 : vector<2x32xf32>
    %151 = math.tanh %150 : vector<2x32xf32>
    %152 = arith.mulf %147, %151 : vector<2x32xf32>
    %153 = tpu.concatenate %26, %44, %62, %80, %98, %116, %134, %152 in 0 : vector<2x32xf32>, vector<2x32xf32>, vector<2x32xf32>, vector<2x32xf32>, vector<2x32xf32>, vector<2x32xf32>, vector<2x32xf32>, vector<2x32xf32> -> vector<16x32xf32>
    %c0_25 = arith.constant 0 : index
    %c0_26 = arith.constant 0 : index
    %154 = vector.load %arg5[%c0_25, %c0_26] : memref<32x128xf32, #tpu.memory_space<vmem>>, vector<32x128xf32>
    %c0_27 = arith.constant 0 : index
    %c0_28 = arith.constant 0 : index
    %155 = vector.load %arg6[%c0_27, %c0_28] : memref<32x128xf32, #tpu.memory_space<vmem>>, vector<32x128xf32>
    %c0_29 = arith.constant 0 : index
    %c0_30 = arith.constant 0 : index
    %156 = vector.load %arg7[%c0_29, %c0_30] : memref<1x128xf32, #tpu.memory_space<vmem>>, vector<1x128xf32>
    %cst_31 = arith.constant dense<0.000000e+00> : vector<16x128xf32>
    %157 = tpu.matmul %153, %154, %cst_31 {dimension_numbers = #tpu.dot_dimension_numbers<[1], [0], [0], [1], [0, 0, 1, 1], [], []>} : vector<16x32xf32>, vector<32x128xf32>, vector<16x128xf32> -> vector<16x128xf32>
    %158 = vector.broadcast %156 : vector<1x128xf32> to vector<16x128xf32>
    %159 = arith.addf %157, %158 : vector<16x128xf32>
    %cst_32 = arith.constant 0.000000e+00 : f32
    %160 = vector.broadcast %cst_32 : f32 to vector<2x32xf32>
    %cst_33 = arith.constant 0.000000e+00 : f32
    %161 = vector.broadcast %cst_33 : f32 to vector<2x32xf32>
    %162 = vector.extract_strided_slice %159 {offsets = [0, 0], sizes = [2, 128], strides = [1, 1]} : vector<16x128xf32> to vector<2x128xf32>
    %cst_34 = arith.constant dense<0.000000e+00> : vector<2x128xf32>
    %163 = tpu.matmul %160, %155, %cst_34 {dimension_numbers = #tpu.dot_dimension_numbers<[1], [0], [0], [1], [0, 0, 1, 1], [], []>} : vector<2x32xf32>, vector<32x128xf32>, vector<2x128xf32> -> vector<2x128xf32>
    %164 = arith.addf %162, %163 : vector<2x128xf32>
    %165 = arith.negf %164 : vector<2x128xf32>
    %166 = math.exp %165 : vector<2x128xf32>
    %cst_35 = arith.constant 1.000000e+00 : f32
    %167 = vector.broadcast %cst_35 : f32 to vector<2x128xf32>
    %168 = arith.addf %167, %166 : vector<2x128xf32>
    %169 = arith.divf %167, %168 : vector<2x128xf32>
    %170 = math.tanh %164 : vector<2x128xf32>
    %171 = vector.extract_strided_slice %169 {offsets = [0, 0], sizes = [2, 32], strides = [1, 1]} : vector<2x128xf32> to vector<2x32xf32>
    %172 = vector.extract_strided_slice %169 {offsets = [0, 32], sizes = [2, 32], strides = [1, 1]} : vector<2x128xf32> to vector<2x32xf32>
    %173 = vector.extract_strided_slice %170 {offsets = [0, 64], sizes = [2, 32], strides = [1, 1]} : vector<2x128xf32> to vector<2x32xf32>
    %174 = vector.extract_strided_slice %169 {offsets = [0, 96], sizes = [2, 32], strides = [1, 1]} : vector<2x128xf32> to vector<2x32xf32>
    %175 = arith.mulf %172, %161 : vector<2x32xf32>
    %176 = arith.mulf %171, %173 : vector<2x32xf32>
    %177 = arith.addf %175, %176 : vector<2x32xf32>
    %178 = math.tanh %177 : vector<2x32xf32>
    %179 = arith.mulf %174, %178 : vector<2x32xf32>
    %180 = vector.extract_strided_slice %159 {offsets = [2, 0], sizes = [2, 128], strides = [1, 1]} : vector<16x128xf32> to vector<2x128xf32>
    %cst_36 = arith.constant dense<0.000000e+00> : vector<2x128xf32>
    %181 = tpu.matmul %179, %155, %cst_36 {dimension_numbers = #tpu.dot_dimension_numbers<[1], [0], [0], [1], [0, 0, 1, 1], [], []>} : vector<2x32xf32>, vector<32x128xf32>, vector<2x128xf32> -> vector<2x128xf32>
    %182 = arith.addf %180, %181 : vector<2x128xf32>
    %183 = arith.negf %182 : vector<2x128xf32>
    %184 = math.exp %183 : vector<2x128xf32>
    %cst_37 = arith.constant 1.000000e+00 : f32
    %185 = vector.broadcast %cst_37 : f32 to vector<2x128xf32>
    %186 = arith.addf %185, %184 : vector<2x128xf32>
    %187 = arith.divf %185, %186 : vector<2x128xf32>
    %188 = math.tanh %182 : vector<2x128xf32>
    %189 = vector.extract_strided_slice %187 {offsets = [0, 0], sizes = [2, 32], strides = [1, 1]} : vector<2x128xf32> to vector<2x32xf32>
    %190 = vector.extract_strided_slice %187 {offsets = [0, 32], sizes = [2, 32], strides = [1, 1]} : vector<2x128xf32> to vector<2x32xf32>
    %191 = vector.extract_strided_slice %188 {offsets = [0, 64], sizes = [2, 32], strides = [1, 1]} : vector<2x128xf32> to vector<2x32xf32>
    %192 = vector.extract_strided_slice %187 {offsets = [0, 96], sizes = [2, 32], strides = [1, 1]} : vector<2x128xf32> to vector<2x32xf32>
    %193 = arith.mulf %190, %177 : vector<2x32xf32>
    %194 = arith.mulf %189, %191 : vector<2x32xf32>
    %195 = arith.addf %193, %194 : vector<2x32xf32>
    %196 = math.tanh %195 : vector<2x32xf32>
    %197 = arith.mulf %192, %196 : vector<2x32xf32>
    %198 = vector.extract_strided_slice %159 {offsets = [4, 0], sizes = [2, 128], strides = [1, 1]} : vector<16x128xf32> to vector<2x128xf32>
    %cst_38 = arith.constant dense<0.000000e+00> : vector<2x128xf32>
    %199 = tpu.matmul %197, %155, %cst_38 {dimension_numbers = #tpu.dot_dimension_numbers<[1], [0], [0], [1], [0, 0, 1, 1], [], []>} : vector<2x32xf32>, vector<32x128xf32>, vector<2x128xf32> -> vector<2x128xf32>
    %200 = arith.addf %198, %199 : vector<2x128xf32>
    %201 = arith.negf %200 : vector<2x128xf32>
    %202 = math.exp %201 : vector<2x128xf32>
    %cst_39 = arith.constant 1.000000e+00 : f32
    %203 = vector.broadcast %cst_39 : f32 to vector<2x128xf32>
    %204 = arith.addf %203, %202 : vector<2x128xf32>
    %205 = arith.divf %203, %204 : vector<2x128xf32>
    %206 = math.tanh %200 : vector<2x128xf32>
    %207 = vector.extract_strided_slice %205 {offsets = [0, 0], sizes = [2, 32], strides = [1, 1]} : vector<2x128xf32> to vector<2x32xf32>
    %208 = vector.extract_strided_slice %205 {offsets = [0, 32], sizes = [2, 32], strides = [1, 1]} : vector<2x128xf32> to vector<2x32xf32>
    %209 = vector.extract_strided_slice %206 {offsets = [0, 64], sizes = [2, 32], strides = [1, 1]} : vector<2x128xf32> to vector<2x32xf32>
    %210 = vector.extract_strided_slice %205 {offsets = [0, 96], sizes = [2, 32], strides = [1, 1]} : vector<2x128xf32> to vector<2x32xf32>
    %211 = arith.mulf %208, %195 : vector<2x32xf32>
    %212 = arith.mulf %207, %209 : vector<2x32xf32>
    %213 = arith.addf %211, %212 : vector<2x32xf32>
    %214 = math.tanh %213 : vector<2x32xf32>
    %215 = arith.mulf %210, %214 : vector<2x32xf32>
    %216 = vector.extract_strided_slice %159 {offsets = [6, 0], sizes = [2, 128], strides = [1, 1]} : vector<16x128xf32> to vector<2x128xf32>
    %cst_40 = arith.constant dense<0.000000e+00> : vector<2x128xf32>
    %217 = tpu.matmul %215, %155, %cst_40 {dimension_numbers = #tpu.dot_dimension_numbers<[1], [0], [0], [1], [0, 0, 1, 1], [], []>} : vector<2x32xf32>, vector<32x128xf32>, vector<2x128xf32> -> vector<2x128xf32>
    %218 = arith.addf %216, %217 : vector<2x128xf32>
    %219 = arith.negf %218 : vector<2x128xf32>
    %220 = math.exp %219 : vector<2x128xf32>
    %cst_41 = arith.constant 1.000000e+00 : f32
    %221 = vector.broadcast %cst_41 : f32 to vector<2x128xf32>
    %222 = arith.addf %221, %220 : vector<2x128xf32>
    %223 = arith.divf %221, %222 : vector<2x128xf32>
    %224 = math.tanh %218 : vector<2x128xf32>
    %225 = vector.extract_strided_slice %223 {offsets = [0, 0], sizes = [2, 32], strides = [1, 1]} : vector<2x128xf32> to vector<2x32xf32>
    %226 = vector.extract_strided_slice %223 {offsets = [0, 32], sizes = [2, 32], strides = [1, 1]} : vector<2x128xf32> to vector<2x32xf32>
    %227 = vector.extract_strided_slice %224 {offsets = [0, 64], sizes = [2, 32], strides = [1, 1]} : vector<2x128xf32> to vector<2x32xf32>
    %228 = vector.extract_strided_slice %223 {offsets = [0, 96], sizes = [2, 32], strides = [1, 1]} : vector<2x128xf32> to vector<2x32xf32>
    %229 = arith.mulf %226, %213 : vector<2x32xf32>
    %230 = arith.mulf %225, %227 : vector<2x32xf32>
    %231 = arith.addf %229, %230 : vector<2x32xf32>
    %232 = math.tanh %231 : vector<2x32xf32>
    %233 = arith.mulf %228, %232 : vector<2x32xf32>
    %234 = vector.extract_strided_slice %159 {offsets = [8, 0], sizes = [2, 128], strides = [1, 1]} : vector<16x128xf32> to vector<2x128xf32>
    %cst_42 = arith.constant dense<0.000000e+00> : vector<2x128xf32>
    %235 = tpu.matmul %233, %155, %cst_42 {dimension_numbers = #tpu.dot_dimension_numbers<[1], [0], [0], [1], [0, 0, 1, 1], [], []>} : vector<2x32xf32>, vector<32x128xf32>, vector<2x128xf32> -> vector<2x128xf32>
    %236 = arith.addf %234, %235 : vector<2x128xf32>
    %237 = arith.negf %236 : vector<2x128xf32>
    %238 = math.exp %237 : vector<2x128xf32>
    %cst_43 = arith.constant 1.000000e+00 : f32
    %239 = vector.broadcast %cst_43 : f32 to vector<2x128xf32>
    %240 = arith.addf %239, %238 : vector<2x128xf32>
    %241 = arith.divf %239, %240 : vector<2x128xf32>
    %242 = math.tanh %236 : vector<2x128xf32>
    %243 = vector.extract_strided_slice %241 {offsets = [0, 0], sizes = [2, 32], strides = [1, 1]} : vector<2x128xf32> to vector<2x32xf32>
    %244 = vector.extract_strided_slice %241 {offsets = [0, 32], sizes = [2, 32], strides = [1, 1]} : vector<2x128xf32> to vector<2x32xf32>
    %245 = vector.extract_strided_slice %242 {offsets = [0, 64], sizes = [2, 32], strides = [1, 1]} : vector<2x128xf32> to vector<2x32xf32>
    %246 = vector.extract_strided_slice %241 {offsets = [0, 96], sizes = [2, 32], strides = [1, 1]} : vector<2x128xf32> to vector<2x32xf32>
    %247 = arith.mulf %244, %231 : vector<2x32xf32>
    %248 = arith.mulf %243, %245 : vector<2x32xf32>
    %249 = arith.addf %247, %248 : vector<2x32xf32>
    %250 = math.tanh %249 : vector<2x32xf32>
    %251 = arith.mulf %246, %250 : vector<2x32xf32>
    %252 = vector.extract_strided_slice %159 {offsets = [10, 0], sizes = [2, 128], strides = [1, 1]} : vector<16x128xf32> to vector<2x128xf32>
    %cst_44 = arith.constant dense<0.000000e+00> : vector<2x128xf32>
    %253 = tpu.matmul %251, %155, %cst_44 {dimension_numbers = #tpu.dot_dimension_numbers<[1], [0], [0], [1], [0, 0, 1, 1], [], []>} : vector<2x32xf32>, vector<32x128xf32>, vector<2x128xf32> -> vector<2x128xf32>
    %254 = arith.addf %252, %253 : vector<2x128xf32>
    %255 = arith.negf %254 : vector<2x128xf32>
    %256 = math.exp %255 : vector<2x128xf32>
    %cst_45 = arith.constant 1.000000e+00 : f32
    %257 = vector.broadcast %cst_45 : f32 to vector<2x128xf32>
    %258 = arith.addf %257, %256 : vector<2x128xf32>
    %259 = arith.divf %257, %258 : vector<2x128xf32>
    %260 = math.tanh %254 : vector<2x128xf32>
    %261 = vector.extract_strided_slice %259 {offsets = [0, 0], sizes = [2, 32], strides = [1, 1]} : vector<2x128xf32> to vector<2x32xf32>
    %262 = vector.extract_strided_slice %259 {offsets = [0, 32], sizes = [2, 32], strides = [1, 1]} : vector<2x128xf32> to vector<2x32xf32>
    %263 = vector.extract_strided_slice %260 {offsets = [0, 64], sizes = [2, 32], strides = [1, 1]} : vector<2x128xf32> to vector<2x32xf32>
    %264 = vector.extract_strided_slice %259 {offsets = [0, 96], sizes = [2, 32], strides = [1, 1]} : vector<2x128xf32> to vector<2x32xf32>
    %265 = arith.mulf %262, %249 : vector<2x32xf32>
    %266 = arith.mulf %261, %263 : vector<2x32xf32>
    %267 = arith.addf %265, %266 : vector<2x32xf32>
    %268 = math.tanh %267 : vector<2x32xf32>
    %269 = arith.mulf %264, %268 : vector<2x32xf32>
    %270 = vector.extract_strided_slice %159 {offsets = [12, 0], sizes = [2, 128], strides = [1, 1]} : vector<16x128xf32> to vector<2x128xf32>
    %cst_46 = arith.constant dense<0.000000e+00> : vector<2x128xf32>
    %271 = tpu.matmul %269, %155, %cst_46 {dimension_numbers = #tpu.dot_dimension_numbers<[1], [0], [0], [1], [0, 0, 1, 1], [], []>} : vector<2x32xf32>, vector<32x128xf32>, vector<2x128xf32> -> vector<2x128xf32>
    %272 = arith.addf %270, %271 : vector<2x128xf32>
    %273 = arith.negf %272 : vector<2x128xf32>
    %274 = math.exp %273 : vector<2x128xf32>
    %cst_47 = arith.constant 1.000000e+00 : f32
    %275 = vector.broadcast %cst_47 : f32 to vector<2x128xf32>
    %276 = arith.addf %275, %274 : vector<2x128xf32>
    %277 = arith.divf %275, %276 : vector<2x128xf32>
    %278 = math.tanh %272 : vector<2x128xf32>
    %279 = vector.extract_strided_slice %277 {offsets = [0, 0], sizes = [2, 32], strides = [1, 1]} : vector<2x128xf32> to vector<2x32xf32>
    %280 = vector.extract_strided_slice %277 {offsets = [0, 32], sizes = [2, 32], strides = [1, 1]} : vector<2x128xf32> to vector<2x32xf32>
    %281 = vector.extract_strided_slice %278 {offsets = [0, 64], sizes = [2, 32], strides = [1, 1]} : vector<2x128xf32> to vector<2x32xf32>
    %282 = vector.extract_strided_slice %277 {offsets = [0, 96], sizes = [2, 32], strides = [1, 1]} : vector<2x128xf32> to vector<2x32xf32>
    %283 = arith.mulf %280, %267 : vector<2x32xf32>
    %284 = arith.mulf %279, %281 : vector<2x32xf32>
    %285 = arith.addf %283, %284 : vector<2x32xf32>
    %286 = math.tanh %285 : vector<2x32xf32>
    %287 = arith.mulf %282, %286 : vector<2x32xf32>
    %288 = vector.extract_strided_slice %159 {offsets = [14, 0], sizes = [2, 128], strides = [1, 1]} : vector<16x128xf32> to vector<2x128xf32>
    %cst_48 = arith.constant dense<0.000000e+00> : vector<2x128xf32>
    %289 = tpu.matmul %287, %155, %cst_48 {dimension_numbers = #tpu.dot_dimension_numbers<[1], [0], [0], [1], [0, 0, 1, 1], [], []>} : vector<2x32xf32>, vector<32x128xf32>, vector<2x128xf32> -> vector<2x128xf32>
    %290 = arith.addf %288, %289 : vector<2x128xf32>
    %291 = arith.negf %290 : vector<2x128xf32>
    %292 = math.exp %291 : vector<2x128xf32>
    %cst_49 = arith.constant 1.000000e+00 : f32
    %293 = vector.broadcast %cst_49 : f32 to vector<2x128xf32>
    %294 = arith.addf %293, %292 : vector<2x128xf32>
    %295 = arith.divf %293, %294 : vector<2x128xf32>
    %296 = math.tanh %290 : vector<2x128xf32>
    %297 = vector.extract_strided_slice %295 {offsets = [0, 0], sizes = [2, 32], strides = [1, 1]} : vector<2x128xf32> to vector<2x32xf32>
    %298 = vector.extract_strided_slice %295 {offsets = [0, 32], sizes = [2, 32], strides = [1, 1]} : vector<2x128xf32> to vector<2x32xf32>
    %299 = vector.extract_strided_slice %296 {offsets = [0, 64], sizes = [2, 32], strides = [1, 1]} : vector<2x128xf32> to vector<2x32xf32>
    %300 = vector.extract_strided_slice %295 {offsets = [0, 96], sizes = [2, 32], strides = [1, 1]} : vector<2x128xf32> to vector<2x32xf32>
    %301 = arith.mulf %298, %285 : vector<2x32xf32>
    %302 = arith.mulf %297, %299 : vector<2x32xf32>
    %303 = arith.addf %301, %302 : vector<2x32xf32>
    %304 = math.tanh %303 : vector<2x32xf32>
    %305 = arith.mulf %300, %304 : vector<2x32xf32>
    %c0_50 = arith.constant 0 : index
    %c0_51 = arith.constant 0 : index
    %306 = vector.load %arg8[%c0_50, %c0_51] : memref<32x16xf32, #tpu.memory_space<vmem>>, vector<32x16xf32>
    %cst_52 = arith.constant dense<0.000000e+00> : vector<2x16xf32>
    %307 = tpu.matmul %305, %306, %cst_52 {dimension_numbers = #tpu.dot_dimension_numbers<[1], [0], [0], [1], [0, 0, 1, 1], [], []>} : vector<2x32xf32>, vector<32x16xf32>, vector<2x16xf32> -> vector<2x16xf32>
    %c0_53 = arith.constant 0 : index
    %c0_54 = arith.constant 0 : index
    %308 = vector.load %arg9[%c0_53, %c0_54] : memref<1x16xf32, #tpu.memory_space<vmem>>, vector<1x16xf32>
    %309 = vector.broadcast %308 : vector<1x16xf32> to vector<2x16xf32>
    %310 = arith.addf %307, %309 : vector<2x16xf32>
    %c0_55 = arith.constant 0 : index
    %c0_56 = arith.constant 0 : index
    %311 = vector.load %arg10[%c0_55, %c0_56] : memref<2x16xf32, #tpu.memory_space<vmem>>, vector<2x16xf32>
    tpu.vector_store %arg10[%c0_55, %c0_56], %310 {strides = array<i32>} : memref<2x16xf32, #tpu.memory_space<vmem>>, vector<2x16xf32>,
    return
  }
  func.func @transform_0(%arg0: i32) -> (i32, i32) {
    %c0_i32 = arith.constant 0 : i32
    %c0_i32_0 = arith.constant 0 : i32
    %c0_i32_1 = arith.constant 0 : i32
    return %c0_i32, %c0_i32_0 : i32, i32
  }
  func.func @transform_1(%arg0: i32) -> (i32, i32) {
    %c0_i32 = arith.constant 0 : i32
    %c0_i32_0 = arith.constant 0 : i32
    %c0_i32_1 = arith.constant 0 : i32
    return %c0_i32, %c0_i32_0 : i32, i32
  }
  func.func @transform_2(%arg0: i32) -> (i32, i32) {
    %c0_i32 = arith.constant 0 : i32
    %c0_i32_0 = arith.constant 0 : i32
    %c0_i32_1 = arith.constant 0 : i32
    return %c0_i32, %c0_i32_0 : i32, i32
  }
  func.func @transform_3(%arg0: i32) -> (i32, i32) {
    %c0_i32 = arith.constant 0 : i32
    %c0_i32_0 = arith.constant 0 : i32
    %c0_i32_1 = arith.constant 0 : i32
    return %c0_i32, %c0_i32_0 : i32, i32
  }
  func.func @transform_4(%arg0: i32) -> (i32, i32) {
    %c0_i32 = arith.constant 0 : i32
    %c0_i32_0 = arith.constant 0 : i32
    %c0_i32_1 = arith.constant 0 : i32
    return %c0_i32, %c0_i32_0 : i32, i32
  }
  func.func @transform_5(%arg0: i32) -> (i32, i32) {
    %c0_i32 = arith.constant 0 : i32
    %c0_i32_0 = arith.constant 0 : i32
    %c0_i32_1 = arith.constant 0 : i32
    return %c0_i32, %c0_i32_0 : i32, i32
  }
  func.func @transform_6(%arg0: i32) -> (i32, i32) {
    %c0_i32 = arith.constant 0 : i32
    %c0_i32_0 = arith.constant 0 : i32
    %c0_i32_1 = arith.constant 0 : i32
    return %c0_i32, %c0_i32_0 : i32, i32
  }
  func.func @transform_7(%arg0: i32) -> (i32, i32) {
    %c0_i32 = arith.constant 0 : i32
    %c0_i32_0 = arith.constant 0 : i32
    %c0_i32_1 = arith.constant 0 : i32
    return %c0_i32, %c0_i32_0 : i32, i32
  }
  func.func @transform_8(%arg0: i32) -> (i32, i32) {
    %c0_i32 = arith.constant 0 : i32
    %c0_i32_0 = arith.constant 0 : i32
    %c0_i32_1 = arith.constant 0 : i32
    return %c0_i32, %c0_i32_0 : i32, i32
  }
  func.func @transform_9(%arg0: i32) -> (i32, i32) {
    %c0_i32 = arith.constant 0 : i32
    %c0_i32_0 = arith.constant 0 : i32
    %c0_i32_1 = arith.constant 0 : i32
    return %c0_i32, %c0_i32_0 : i32, i32
  }
}

</mosaic_0001>

<bundles_post_ra>
// kernel: deeplog_forward.1
= control target key start
LH: loop header
LB: loop body
LE: loop exit
PB: predicated region body
PF: predicated region fallthrough
CT: control target
= control target key end

     0   :  { %v2524_v3 = vmov 0.0   ;;  %vm50_vm0 = vcmask 261120   ;;  %s2969_s0 = inlined_call_operand.vmem [shape: f32[16,32], index: 0, kind: input, shape index: {}]   ;;  %s2970_s1 = inlined_call_operand.vmem [shape: f32[32,128], index: 1, kind: input, shape index: {}]   ;;  %s2971_s2 = inlined_call_operand.vmem [shape: f32[32,128], index: 2, kind: input, shape index: {}]   ;;  %s2972_s3 = inlined_call_operand.vmem [shape: f32[1,128], index: 3, kind: input, shape index: {}]   ;;  %s2973_s4 = inlined_call_operand.vmem [shape: f32[32,128], index: 4, kind: input, shape index: {}]   ;;  %s2974_s5 = inlined_call_operand.vmem [shape: f32[32,128], index: 5, kind: input, shape index: {}]   ;;  %s2975_s6 = inlined_call_operand.vmem [shape: f32[1,128], index: 6, kind: input, shape index: {}]   ;;  %s2976_s7 = inlined_call_operand.vmem [shape: f32[32,16], index: 7, kind: input, shape index: {}]   ;;  %s2977_s8 = inlined_call_operand.vmem [shape: f32[1,16], index: 8, kind: input, shape index: {}]   ;;  %s2978_s9 = inlined_call_operand.hbm [shape: f32[2,16], index: 9, kind: output, shape index: {}]  }
   0x1   :  { %v38_v0 = vld [vmem:[%s2970_s1 + $0x18] sm:$0xff]  ;;  %v37_v1 = vld [vmem:[%s2970_s1 + $0x10] sm:$0xff]  ;;  %2171 = vmatprep.subr.mxu1 %v2524_v3  ;;  %v36_v5 = vld [vmem:[%s2970_s1 + $0x8] sm:$0xff] }
   0x2   :  { %v2588_v2 = vld [vmem:[%s2971_s2 + $0x18] sm:$0xff]  ;;  %2160 = vmatprep.subr.mxu0 %v38_v0  ;;  %v2594_v4 = vld [vmem:[%s2971_s2 + $0x10] sm:$0xff]  ;;  %v33_v6 = vld [vmem:[%s2969_s0] sm:$0xff] }
   0x3   :  { %2161 = vmatpush3.msra.mxu0 %v38_v0  ;;  %2172 = vmatpush3.msra.mxu1 %v2588_v2 }
   0x4   :  { %2162 = vmatprep.subr.mxu0 %v37_v1  ;;  %2173 = vmatprep.subr.mxu1 %v2524_v3 }
   0x5   :  { %14 = vsyncpa [#allocation3], 0  ;;  %2163 = vmatpush3.msra.mxu0 %v37_v1  ;;  %2174 = vmatpush3.msra.mxu1 %v2594_v4  ;;  %v35_v7 = vld [vmem:[%s2970_s1] sm:$0xff]  ;;  %v2611_v8 = vld [vmem:[%s2971_s2 + $0x8] sm:$0xff]  ;;  %vm2525_vm1 = vmmov 0   ;;  %vm974_vm2 = vcmask 1041408  }
   0x6   :  { %2164 = vmatprep.subr.mxu0 %v36_v5  ;;  %2175 = vmatprep.subr.mxu1 %v2524_v3  ;;  %v34_v9 = vld [vmem:[%s2969_s0 + $0x8] sm:$0xff]  ;;  %v2621_v10 = vld [vmem:[%s2971_s2] sm:$0xff]  ;;  %s2526_s2 = smov 64   ;;  %vm976_vm3 = vcmask 1043456   ;;  %vm978_vm4 = vcmask 1045504   ;;  %vm2009_vm5 = vcmask 123904  }
   0x7   :  { %2165 = vmatpush3.msra.mxu0 %v36_v5  ;;  %2168 = vmatprep.mubr.msk.f32.mxu0 %vm50_vm0, %v33_v6  ;;  %v2025_v11 = vld [vmem:[%s2972_s3] ss:$0 sm:$0xff]  ;;  %s2527_s3 = smov 32  }
   0x8   :  { %2166 = vmatprep.subr.mxu0 %v35_v7  ;;  %2176 = vmatpush3.msra.mxu1 %v2611_v8 }
   0x9   :  { %2167 = vmatpush3.msra.mxu0 %v35_v7  ;;  %2177 = vmatprep.subr.mxu1 %v2524_v3 }
   0xa   :  { %2169 = vmatmul.mubr.msk.f32.vlgmr.msra.gmra.mxu0 %vm50_vm0, %v34_v9  ;;  %2178 = vmatpush3.msra.mxu1 %v2621_v10 }
   0xb   :  { %2179 = vmatprep.mubr.msk.f32.mxu1 %vm2525_vm1, %v2524_v3  ;;  %2182 = vmatprep.subr.mxu0 %v2524_v3 }
   0xc   :  { %2180 = vmatmul.mubr.f32.vlgmr.msra.gmra.mxu1 %v2524_v3  ;;  %2183 = vmatpush3.msra.mxu0 %v2588_v2 }
   0xd   :  { %2184 = vmatprep.subr.mxu0 %v2524_v3  ;;  %2190 = vmatprep.mubr.msk.f32.mxu0 %vm2525_vm1, %v2524_v3 }
   0xe   :  { %2185 = vmatpush3.msra.mxu0 %v2594_v4  ;;  %2193 = vmatprep.subr.mxu1 %v2524_v3 }
   0xf   :  { %2186 = vmatprep.subr.mxu0 %v2524_v3  ;;  %2194 = vmatpush3.msra.mxu1 %v2588_v2 }
  0x10   :  { %2187 = vmatpush3.msra.mxu0 %v2611_v8  ;;  %2195 = vmatprep.subr.mxu1 %v2524_v3 }
  0x11   :  { %2188 = vmatprep.subr.mxu0 %v2524_v3  ;;  %2196 = vmatpush3.msra.mxu1 %v2594_v4 }
  0x12   :  { %2189 = vmatpush3.msra.mxu0 %v2621_v10  ;;  %2197 = vmatprep.subr.mxu1 %v2524_v3 }
  0x13   :  { %2198 = vmatpush3.msra.mxu1 %v2611_v8  ;;  %2201 = vmatprep.mubr.msk.f32.mxu1 %vm2525_vm1, %v2524_v3 }
  0x14   :  { %2199 = vmatprep.subr.mxu1 %v2524_v3  ;;  %2204 = vmatprep.subr.mxu0 %v2524_v3 }
  0x15   :  { %2200 = vmatpush3.msra.mxu1 %v2621_v10 }
  0x16   :  { %2215 = vmatprep.subr.mxu1 %v2524_v3 }
  0xca   :  { %v2170_v12 = vpop.f32.mrf.mxu0 }
  0xcb   :  { %v2655_v13 = vadd.f32 %v2170_v12, %v2025_v11 }
  0xcc   :  { %v123_v14 = vpop.f32.mrf.mxu0  ;;  %v201_v15 = vpop.f32.mrf.mxu1 }
  0xcd   :  { %v2657_v16 = vadd.f32 %v2025_v11, %v123_v14 }
  0xce   :  { %v2181_v17 = vpop.f32.mrf.mxu1 }
  0xcf   :  { %v205_v18 = vadd.f32 %v201_v15, %v2657_v16 }
  0xd1   :  { %2374 = vtanh.f32 %v205_v18  ;;  %v2028_v20 = vmul.f32 -1.442695, %v205_v18 }
  0xd3   :  { %2376 = vpow2.f32 %v2028_v20 }
  0xde   :  { %v2375_v19 = vpop.eup %2374 }
  0xdf   :  { %215 = vrot.lane.b32.xlu0 %v2375_v19, %s2526_s2 }
  0xe0   :  { %v2377_v21 = vpop.eup %2376 }
  0xe1   :  { %v209_v22 = vadd.f32 1.0, %v2377_v21 }
  0xe3   :  { %2378 = vrcp.f32 %v209_v22 }
  0xf0   :  { %v2379_v23 = vpop.eup %2378 }
  0xf1   :  { %v213_v26 = vmul.f32 0.0, %v2379_v23 }
 0x151   :  { %v216_v24 = vpop.permute.xlu0 %215 }
 0x152   :  { %v218_v25 = vmul.f32 %v2379_v23, %v216_v24 }
 0x154   :  { %220 = vrot.lane.b32.xlu0 %v218_v25, %s2527_s3 }
 0x1c6   :  { %v221_v27 = vpop.permute.xlu0 %220 }
 0x1c7   :  { %v223_v28 = vadd.f32 %v221_v27, %v213_v26 }
 0x1c9   :  { %2380 = vtanh.f32 %v223_v28  ;;  %v317_v44 = vrot.slane %v223_v28, 6 }
 0x1d6   :  { %v2381_v29 = vpop.eup %2380 }
 0x1d7   :  { %226 = vrot.lane.b32.xlu1 %v2381_v29, %s2526_s2 }
 0x249   :  { %v227_v30 = vpop.permute.xlu1 %226 }
 0x24a   :  { %v2663_v31 = vmul.f32 %v2379_v23, %v227_v30 }
 0x24c   :  { %231 = vrot.lane.b32.xlu1 %v2663_v31, %s2527_s3 }
 0x2be   :  { %v232_v32 = vpop.permute.xlu1 %231 }
 0x2bf   :  { %2191 = vmatmul.mubr.msk.f32.vlgmr.msra.gmra.mxu0 %vm50_vm0, %v232_v32 }
 0x2c0   :  { %2205 = vmatpush3.msra.mxu0 %v2588_v2  ;;  %2212 = vmatprep.mubr.msk.f32.mxu0 %vm2525_vm1, %v2524_v3 }
 0x2c1   :  { %2206 = vmatprep.subr.mxu0 %v2524_v3 }
 0x2c2   :  { %2207 = vmatpush3.msra.mxu0 %v2594_v4 }
 0x2c3   :  { %2208 = vmatprep.subr.mxu0 %v2524_v3 }
 0x2c4   :  { %2209 = vmatpush3.msra.mxu0 %v2611_v8 }
 0x2c5   :  { %2210 = vmatprep.subr.mxu0 %v2524_v3 }
 0x2c6   :  { %2211 = vmatpush3.msra.mxu0 %v2621_v10 }
 0x2c7   :  { %2226 = vmatprep.subr.mxu0 %v2524_v3 }
 0x37f   :  { %v301_v33 = vpop.f32.mrf.mxu0 }
 0x380   :  { %v306_v34 = vrot.slane %v301_v33, 6 }
 0x381   :  { %v2192_v35 = vpop.f32.mrf.mxu0 }
 0x382   :  { %v308_v36 = vadd.f32 %v306_v34, %v2657_v16 }
 0x384   :  { %2382 = vtanh.f32 %v308_v36  ;;  %v2030_v38 = vmul.f32 -1.442695, %v308_v36 }
 0x386   :  { %2384 = vpow2.f32 %v2030_v38 }
 0x391   :  { %v2383_v37 = vpop.eup %2382 }
 0x392   :  { %321 = vrot.lane.b32.xlu0 %v2383_v37, %s2526_s2 }
 0x393   :  { %v2385_v39 = vpop.eup %2384 }
 0x394   :  { %v312_v40 = vadd.f32 1.0, %v2385_v39 }
 0x396   :  { %2386 = vrcp.f32 %v312_v40 }
 0x3a3   :  { %v2387_v41 = vpop.eup %2386 }
 0x3a4   :  { %v319_v45 = vmul.f32 %v2387_v41, %v317_v44 }
 0x404   :  { %v322_v42 = vpop.permute.xlu0 %321 }
 0x405   :  { %v324_v43 = vmul.f32 %v2387_v41, %v322_v42 }
 0x407   :  { %326 = vrot.lane.b32.xlu1 %v324_v43, %s2527_s3 }
 0x479   :  { %v327_v46 = vpop.permute.xlu1 %326 }
 0x47a   :  { %v329_v47 = vadd.f32 %v327_v46, %v319_v45 }
 0x47c   :  { %2388 = vtanh.f32 %v329_v47  ;;  %v424_v0 = vrot.slane %v329_v47, 6 }
 0x489   :  { %v2389_v48 = vpop.eup %2388 }
 0x48a   :  { %332 = vrot.lane.b32.xlu0 %v2389_v48, %s2526_s2 }
 0x4fc   :  { %v333_v49 = vpop.permute.xlu0 %332 }
 0x4fd   :  { %v335_v50 = vmul.f32 %v2387_v41, %v333_v49 }
 0x4ff   :  { %v337_v51 = vrot.slane %v335_v50, 2  ;;  %v975_v12 = vsel %vm974_vm2, %v2663_v31, %v335_v50 }
 0x501   :  { %338 = vrot.lane.b32.xlu1 %v337_v51, %s2527_s3 }
 0x573   :  { %v339_v52 = vpop.permute.xlu1 %338 }
 0x574   :  { %2202 = vmatmul.mubr.msk.f32.vlgmr.msra.gmra.mxu1 %vm50_vm0, %v339_v52 }
 0x575   :  { %2216 = vmatpush3.msra.mxu1 %v2588_v2  ;;  %2223 = vmatprep.mubr.msk.f32.mxu1 %vm2525_vm1, %v2524_v3 }
 0x576   :  { %2217 = vmatprep.subr.mxu1 %v2524_v3 }
 0x577   :  { %2218 = vmatpush3.msra.mxu1 %v2594_v4 }
 0x578   :  { %2219 = vmatprep.subr.mxu1 %v2524_v3 }
 0x579   :  { %2220 = vmatpush3.msra.mxu1 %v2611_v8 }
 0x57a   :  { %2221 = vmatprep.subr.mxu1 %v2524_v3 }
 0x57b   :  { %2222 = vmatpush3.msra.mxu1 %v2621_v10 }
 0x57c   :  { %2237 = vmatprep.subr.mxu1 %v2524_v3 }
 0x634   :  { %v408_v53 = vpop.f32.mrf.mxu1 }
 0x635   :  { %v413_v54 = vrot.slane %v408_v53, 4 }
 0x636   :  { %v2203_v55 = vpop.f32.mrf.mxu1 }
 0x637   :  { %v415_v56 = vadd.f32 %v413_v54, %v2657_v16 }
 0x639   :  { %2390 = vtanh.f32 %v415_v56  ;;  %v2032_v58 = vmul.f32 -1.442695, %v415_v56 }
 0x63b   :  { %2392 = vpow2.f32 %v2032_v58 }
 0x646   :  { %v2391_v57 = vpop.eup %2390 }
 0x647   :  { %428 = vrot.lane.b32.xlu0 %v2391_v57, %s2526_s2 }
 0x648   :  { %v2393_v59 = vpop.eup %2392 }
 0x649   :  { %v419_v60 = vadd.f32 1.0, %v2393_v59 }
 0x64b   :  { %2394 = vrcp.f32 %v419_v60 }
 0x658   :  { %v2395_v61 = vpop.eup %2394 }
 0x659   :  { %v426_v1 = vmul.f32 %v2395_v61, %v424_v0 }
 0x6b9   :  { %v429_v62 = vpop.permute.xlu0 %428 }
 0x6ba   :  { %v431_v63 = vmul.f32 %v2395_v61, %v429_v62 }
 0x6bc   :  { %433 = vrot.lane.b32.xlu1 %v431_v63, %s2527_s3 }
 0x72e   :  { %v434_v5 = vpop.permute.xlu1 %433 }
 0x72f   :  { %v436_v6 = vadd.f32 %v434_v5, %v426_v1 }
 0x731   :  { %2396 = vtanh.f32 %v436_v6  ;;  %v531_v29 = vrot.slane %v436_v6, 6 }
 0x73e   :  { %v2397_v7 = vpop.eup %2396 }
 0x73f   :  { %439 = vrot.lane.b32.xlu0 %v2397_v7, %s2526_s2 }
 0x7b1   :  { %v440_v9 = vpop.permute.xlu0 %439 }
 0x7b2   :  { %v442_v11 = vmul.f32 %v2395_v61, %v440_v9 }
 0x7b4   :  { %v444_v14 = vrot.slane %v442_v11, 4  ;;  %v977_v15 = vsel %vm976_vm3, %v975_v12, %v442_v11 }
 0x7b6   :  { %445 = vrot.lane.b32.xlu1 %v444_v14, %s2527_s3 }
 0x828   :  { %v446_v17 = vpop.permute.xlu1 %445 }
 0x829   :  { %2213 = vmatmul.mubr.msk.f32.vlgmr.msra.gmra.mxu0 %vm50_vm0, %v446_v17 }
 0x82a   :  { %2227 = vmatpush3.msra.mxu0 %v2588_v2  ;;  %2234 = vmatprep.mubr.msk.f32.mxu0 %vm2525_vm1, %v2524_v3 }
 0x82b   :  { %2228 = vmatprep.subr.mxu0 %v2524_v3 }
 0x82c   :  { %2229 = vmatpush3.msra.mxu0 %v2594_v4 }
 0x82d   :  { %2230 = vmatprep.subr.mxu0 %v2524_v3 }
 0x82e   :  { %2231 = vmatpush3.msra.mxu0 %v2611_v8 }
 0x82f   :  { %2232 = vmatprep.subr.mxu0 %v2524_v3 }
 0x830   :  { %2233 = vmatpush3.msra.mxu0 %v2621_v10 }
 0x831   :  { %2248 = vmatprep.subr.mxu0 %v2524_v3 }
 0x8e9   :  { %v515_v18 = vpop.f32.mrf.mxu0 }
 0x8ea   :  { %v520_v19 = vrot.slane %v515_v18, 2 }
 0x8eb   :  { %v2214_v20 = vpop.f32.mrf.mxu0 }
 0x8ec   :  { %v522_v21 = vadd.f32 %v520_v19, %v2657_v16 }
 0x8ee   :  { %2398 = vtanh.f32 %v522_v21  ;;  %v2034_v23 = vmul.f32 -1.442695, %v522_v21 }
 0x8f0   :  { %2400 = vpow2.f32 %v2034_v23 }
 0x8fb   :  { %v2399_v22 = vpop.eup %2398 }
 0x8fc   :  { %535 = vrot.lane.b32.xlu0 %v2399_v22, %s2526_s2 }
 0x8fd   :  { %v2401_v24 = vpop.eup %2400 }
 0x8fe   :  { %v526_v25 = vadd.f32 1.0, %v2401_v24 }
 0x900   :  { %2402 = vrcp.f32 %v526_v25 }
 0x90d   :  { %v2403_v26 = vpop.eup %2402 }
 0x90e   :  { %v533_v30 = vmul.f32 %v2403_v26, %v531_v29 }
 0x96e   :  { %v536_v27 = vpop.permute.xlu0 %535 }
 0x96f   :  { %v538_v28 = vmul.f32 %v2403_v26, %v536_v27 }
 0x971   :  { %540 = vrot.lane.b32.xlu1 %v538_v28, %s2527_s3 }
 0x9e3   :  { %v541_v31 = vpop.permute.xlu1 %540 }
 0x9e4   :  { %v543_v32 = vadd.f32 %v541_v31, %v533_v30 }
 0x9e6   :  { %2404 = vtanh.f32 %v543_v32  ;;  %v635_v48 = vrot.slane %v543_v32, 6 }
 0x9f3   :  { %v2405_v16 = vpop.eup %2404 }
 0x9f4   :  { %546 = vrot.lane.b32.xlu0 %v2405_v16, %s2526_s2 }
 0xa66   :  { %v547_v33 = vpop.permute.xlu0 %546 }
 0xa67   :  { %v549_v34 = vmul.f32 %v2403_v26, %v547_v33 }
 0xa69   :  { %v551_v35 = vrot.slane %v549_v34, 6  ;;  %v2718_v36 = vsel %vm978_vm4, %v977_v15, %v549_v34 }
 0xa6b   :  { %552 = vrot.lane.b32.xlu1 %v551_v35, %s2527_s3 }
 0xadd   :  { %v553_v37 = vpop.permute.xlu1 %552 }
 0xade   :  { %2224 = vmatmul.mubr.msk.f32.vlgmr.msra.gmra.mxu1 %vm50_vm0, %v553_v37 }
 0xadf   :  { %2238 = vmatpush3.msra.mxu1 %v2588_v2  ;;  %2245 = vmatprep.mubr.msk.f32.mxu1 %vm2525_vm1, %v2524_v3 }
 0xae0   :  { %2239 = vmatprep.subr.mxu1 %v2524_v3 }
 0xae1   :  { %2240 = vmatpush3.msra.mxu1 %v2594_v4 }
 0xae2   :  { %2241 = vmatprep.subr.mxu1 %v2524_v3 }
 0xae3   :  { %2242 = vmatpush3.msra.mxu1 %v2611_v8 }
 0xae4   :  { %2243 = vmatprep.subr.mxu1 %v2524_v3 }
 0xae5   :  { %2244 = vmatpush3.msra.mxu1 %v2621_v10 }
 0xb9e   :  { %v622_v38 = vpop.f32.mrf.mxu1 }
 0xb9f   :  { %v626_v39 = vadd.f32 %v622_v38, %v2655_v13 }
 0xba0   :  { %v2225_v40 = vpop.f32.mrf.mxu1 }
 0xba1   :  { %2406 = vtanh.f32 %v626_v39  ;;  %v2036_v42 = vmul.f32 -1.442695, %v626_v39 }
 0xba3   :  { %2408 = vpow2.f32 %v2036_v42 }
 0xbae   :  { %v2407_v41 = vpop.eup %2406 }
 0xbaf   :  { %639 = vrot.lane.b32.xlu0 %v2407_v41, %s2526_s2 }
 0xbb0   :  { %v2409_v43 = vpop.eup %2408 }
 0xbb1   :  { %v630_v44 = vadd.f32 1.0, %v2409_v43 }
 0xbb3   :  { %2410 = vrcp.f32 %v630_v44 }
 0xbc0   :  { %v2411_v45 = vpop.eup %2410 }
 0xbc1   :  { %v637_v49 = vmul.f32 %v2411_v45, %v635_v48 }
 0xc21   :  { %v640_v46 = vpop.permute.xlu0 %639 }
 0xc22   :  { %v642_v47 = vmul.f32 %v2411_v45, %v640_v46 }
 0xc24   :  { %644 = vrot.lane.b32.xlu1 %v642_v47, %s2527_s3 }
 0xc96   :  { %v645_v50 = vpop.permute.xlu1 %644 }
 0xc97   :  { %v647_v51 = vadd.f32 %v645_v50, %v637_v49 }
 0xc99   :  { %2412 = vtanh.f32 %v647_v51 }
 0xca6   :  { %v2413_v52 = vpop.eup %2412 }
 0xca7   :  { %650 = vrot.lane.b32.xlu0 %v2413_v52, %s2526_s2  ;;  %v986_v52 = vld [vmem:[%s2973_s4 + $0x18] sm:$0xff] }
 0xca8   :  { %2259 = vmatprep.subr.mxu1 %v986_v52 }
 0xd19   :  { %v651_v53 = vpop.permute.xlu0 %650 }
 0xd1a   :  { %v2735_v54 = vmul.f32 %v2411_v45, %v651_v53  ;;  %v985_v53 = vld [vmem:[%s2973_s4 + $0x10] sm:$0xff] }
 0xd1c   :  { %655 = vrot.lane.b32.xlu1 %v2735_v54, %s2527_s3 }
 0xd8e   :  { %v656_v55 = vpop.permute.xlu1 %655 }
 0xd8f   :  { %2235 = vmatmul.mubr.msk.f32.vlgmr.msra.gmra.mxu0 %vm50_vm0, %v656_v55  ;;  %v984_v55 = vld [vmem:[%s2973_s4 + $0x8] sm:$0xff] }
 0xd90   :  { %2249 = vmatpush3.msra.mxu0 %v2588_v2  ;;  %2256 = vmatprep.mubr.msk.f32.mxu0 %vm2525_vm1, %v2524_v3 }
 0xd91   :  { %2250 = vmatprep.subr.mxu0 %v2524_v3 }
 0xd92   :  { %2251 = vmatpush3.msra.mxu0 %v2594_v4 }
 0xd93   :  { %2252 = vmatprep.subr.mxu0 %v2524_v3 }
 0xd94   :  { %2253 = vmatpush3.msra.mxu0 %v2611_v8 }
 0xd95   :  { %2254 = vmatprep.subr.mxu0 %v2524_v3 }
 0xd96   :  { %2255 = vmatpush3.msra.mxu0 %v2621_v10  ;;  %v741_v10 = vrot.slane %v647_v51, 6 }
 0xd97   :  { %2270 = vmatprep.subr.mxu0 %v2524_v3 }
 0xe4f   :  { %v725_v56 = vpop.f32.mrf.mxu0 }
 0xe50   :  { %v730_v57 = vrot.slane %v725_v56, 6  ;;  %v2799_v56 = vld [vmem:[%s2974_s5 + $0x8] sm:$0xff] }
 0xe51   :  { %v2236_v2 = vpop.f32.mrf.mxu0 }
 0xe52   :  { %v732_v58 = vadd.f32 %v730_v57, %v2655_v13  ;;  %v983_v57 = vld [vmem:[%s2973_s4] sm:$0xff] }
 0xe54   :  { %2414 = vtanh.f32 %v732_v58  ;;  %v2038_v4 = vmul.f32 -1.442695, %v732_v58  ;;  %v2813_v58 = vld [vmem:[%s2974_s5] sm:$0xff] }
 0xe56   :  { %2416 = vpow2.f32 %v2038_v4 }
 0xe61   :  { %v2415_v59 = vpop.eup %2414 }
 0xe62   :  { %745 = vrot.lane.b32.xlu0 %v2415_v59, %s2526_s2 }
 0xe63   :  { %v2417_v60 = vpop.eup %2416 }
 0xe64   :  { %v736_v61 = vadd.f32 1.0, %v2417_v60 }
 0xe66   :  { %2418 = vrcp.f32 %v736_v61 }
 0xe73   :  { %v2419_v8 = vpop.eup %2418 }
 0xe74   :  { %v743_v0 = vmul.f32 %v2419_v8, %v741_v10 }
 0xed4   :  { %v746_v62 = vpop.permute.xlu0 %745 }
 0xed5   :  { %v748_v63 = vmul.f32 %v2419_v8, %v746_v62 }
 0xed7   :  { %750 = vrot.lane.b32.xlu1 %v748_v63, %s2527_s3  ;;  %v2043_v63 = vld [vmem:[%s2975_s6] ss:$0 sm:$0xff] }
 0xf49   :  { %v751_v1 = vpop.permute.xlu1 %750 }
 0xf4a   :  { %v753_v5 = vadd.f32 %v751_v1, %v743_v0 }
 0xf4c   :  { %2420 = vtanh.f32 %v753_v5  ;;  %v848_v26 = vrot.slane %v753_v5, 6 }
 0xf59   :  { %v2421_v6 = vpop.eup %2420 }
 0xf5a   :  { %756 = vrot.lane.b32.xlu0 %v2421_v6, %s2526_s2 }
 0xfcc   :  { %v757_v7 = vpop.permute.xlu0 %756 }
 0xfcd   :  { %v759_v9 = vmul.f32 %v2419_v8, %v757_v7 }
 0xfcf   :  { %v761_v11 = vrot.slane %v759_v9, 2  ;;  %v980_v16 = vsel %vm974_vm2, %v2735_v54, %v759_v9  ;;  %v2790_v54 = vld [vmem:[%s2974_s5 + $0x10] sm:$0xff] }
 0xfd1   :  { %762 = vrot.lane.b32.xlu1 %v761_v11, %s2527_s3 }
0x1043   :  { %v763_v12 = vpop.permute.xlu1 %762 }
0x1044   :  { %2246 = vmatmul.mubr.msk.f32.vlgmr.msra.gmra.mxu1 %vm50_vm0, %v763_v12 }
0x1045   :  { %2260 = vmatpush3.msra.mxu1 %v986_v52 }
0x1046   :  { %2261 = vmatprep.subr.mxu1 %v985_v53 }
0x1047   :  { %2262 = vmatpush3.msra.mxu1 %v985_v53 }
0x1048   :  { %2263 = vmatprep.subr.mxu1 %v984_v55 }
0x1049   :  { %2264 = vmatpush3.msra.mxu1 %v984_v55 }
0x104a   :  { %2265 = vmatprep.subr.mxu1 %v983_v57 }
0x104b   :  { %2266 = vmatpush3.msra.mxu1 %v983_v57 }
0x104c   :  { %2281 = vmatprep.subr.mxu1 %v2524_v3 }
0x1104   :  { %v832_v14 = vpop.f32.mrf.mxu1 }
0x1105   :  { %v837_v15 = vrot.slane %v832_v14, 4 }
0x1106   :  { %v2247_v17 = vpop.f32.mrf.mxu1 }
0x1107   :  { %v839_v18 = vadd.f32 %v837_v15, %v2655_v13 }
0x1109   :  { %2422 = vtanh.f32 %v839_v18  ;;  %v2040_v20 = vmul.f32 -1.442695, %v839_v18 }
0x110b   :  { %2424 = vpow2.f32 %v2040_v20 }
0x1116   :  { %v2423_v19 = vpop.eup %2422 }
0x1117   :  { %852 = vrot.lane.b32.xlu0 %v2423_v19, %s2526_s2 }
0x1118   :  { %v2425_v21 = vpop.eup %2424 }
0x1119   :  { %v843_v22 = vadd.f32 1.0, %v2425_v21 }
0x111b   :  { %2426 = vrcp.f32 %v843_v22 }
0x1128   :  { %v2427_v23 = vpop.eup %2426 }
0x1129   :  { %v850_v27 = vmul.f32 %v2427_v23, %v848_v26 }
0x1189   :  { %v853_v24 = vpop.permute.xlu0 %852 }
0x118a   :  { %v855_v25 = vmul.f32 %v2427_v23, %v853_v24 }
0x118c   :  { %857 = vrot.lane.b32.xlu1 %v855_v25, %s2527_s3 }
0x11fe   :  { %v858_v28 = vpop.permute.xlu1 %857 }
0x11ff   :  { %v860_v29 = vadd.f32 %v858_v28, %v850_v27 }
0x1201   :  { %2428 = vtanh.f32 %v860_v29  ;;  %v955_v48 = vrot.slane %v860_v29, 6 }
0x120e   :  { %v2429_v30 = vpop.eup %2428 }
0x120f   :  { %863 = vrot.lane.b32.xlu0 %v2429_v30, %s2526_s2 }
0x1281   :  { %v864_v31 = vpop.permute.xlu0 %863 }
0x1282   :  { %v866_v32 = vmul.f32 %v2427_v23, %v864_v31 }
0x1284   :  { %v868_v33 = vrot.slane %v866_v32, 4  ;;  %v2763_v34 = vsel %vm976_vm3, %v980_v16, %v866_v32 }
0x1286   :  { %869 = vrot.lane.b32.xlu1 %v868_v33, %s2527_s3 }
0x12f8   :  { %v870_v35 = vpop.permute.xlu1 %869 }
0x12f9   :  { %2257 = vmatmul.mubr.msk.f32.vlgmr.msra.gmra.mxu0 %vm50_vm0, %v870_v35 }
0x12fa   :  { %2278 = vmatprep.mubr.msk.f32.mxu0 %vm2525_vm1, %v2524_v3 }
0x13b9   :  { %v939_v37 = vpop.f32.mrf.mxu0 }
0x13ba   :  { %v944_v38 = vrot.slane %v939_v37, 2 }
0x13bb   :  { %v2258_v39 = vpop.f32.mrf.mxu0 }
0x13bc   :  { %v946_v40 = vadd.f32 %v944_v38, %v2655_v13 }
0x13be   :  { %2430 = vtanh.f32 %v946_v40  ;;  %v2042_v42 = vmul.f32 -1.442695, %v946_v40 }
0x13c0   :  { %2432 = vpow2.f32 %v2042_v42 }
0x13cb   :  { %v2431_v41 = vpop.eup %2430 }
0x13cc   :  { %959 = vrot.lane.b32.xlu0 %v2431_v41, %s2526_s2 }
0x13cd   :  { %v2433_v43 = vpop.eup %2432 }
0x13ce   :  { %v950_v44 = vadd.f32 1.0, %v2433_v43 }
0x13d0   :  { %2434 = vrcp.f32 %v950_v44 }
0x13dd   :  { %v2435_v45 = vpop.eup %2434 }
0x13de   :  { %v957_v49 = vmul.f32 %v2435_v45, %v955_v48 }
0x143e   :  { %v960_v46 = vpop.permute.xlu0 %959 }
0x143f   :  { %v962_v47 = vmul.f32 %v2435_v45, %v960_v46 }
0x1441   :  { %964 = vrot.lane.b32.xlu1 %v962_v47, %s2527_s3 }
0x1445   :  { %1000 = vrot.lane.b32.xlu1 %v2718_v36, %s2527_s3  ;;  %v2784_v36 = vld [vmem:[%s2974_s5 + $0x18] sm:$0xff] }
0x1446   :  { %2271 = vmatpush3.msra.mxu0 %v2784_v36 }
0x1447   :  { %2272 = vmatprep.subr.mxu0 %v2524_v3 }
0x1448   :  { %2273 = vmatpush3.msra.mxu0 %v2790_v54 }
0x1449   :  { %2274 = vmatprep.subr.mxu0 %v2524_v3 }
0x144a   :  { %2275 = vmatpush3.msra.mxu0 %v2799_v56 }
0x144b   :  { %2276 = vmatprep.subr.mxu0 %v2524_v3 }
0x144c   :  { %2277 = vmatpush3.msra.mxu0 %v2813_v58 }
0x144d   :  { %2279 = vmatmul.mubr.f32.vlgmr.msra.gmra.mxu0 %v2524_v3  ;;  %2292 = vmatprep.subr.mxu0 %v2524_v3 }
0x144e   :  { %2293 = vmatpush3.msra.mxu0 %v2784_v36  ;;  %2300 = vmatprep.mubr.msk.f32.mxu0 %vm2525_vm1, %v2524_v3 }
0x144f   :  { %2294 = vmatprep.subr.mxu0 %v2524_v3 }
0x1450   :  { %2295 = vmatpush3.msra.mxu0 %v2790_v54 }
0x1451   :  { %2296 = vmatprep.subr.mxu0 %v2524_v3 }
0x1452   :  { %2297 = vmatpush3.msra.mxu0 %v2799_v56 }
0x1453   :  { %2298 = vmatprep.subr.mxu0 %v2524_v3 }
0x1454   :  { %2299 = vmatpush3.msra.mxu0 %v2813_v58 }
0x1455   :  { %2314 = vmatprep.subr.mxu0 %v2524_v3 }
0x14b3   :  { %v965_v13 = vpop.permute.xlu1 %964 }
0x14b4   :  { %v967_v50 = vadd.f32 %v965_v13, %v957_v49 }
0x14b6   :  { %2436 = vtanh.f32 %v967_v50 }
0x14b7   :  { %v1001_v51 = vpop.permute.xlu1 %1000 }
0x14b8   :  { %2267 = vmatprep.mubr.msk.f32.mxu1 %vm50_vm0, %v1001_v51 }
0x14c3   :  { %v2437_v2 = vpop.eup %2436 }
0x14c4   :  { %970 = vrot.lane.b32.xlu0 %v2437_v2, %s2526_s2 }
0x150d   :  { %v1149_v8 = vpop.f32.mrf.mxu0 }
0x150f   :  { %v2280_v62 = vpop.f32.mrf.mxu0 }
0x1536   :  { %v971_v59 = vpop.permute.xlu0 %970 }
0x1537   :  { %v973_v4 = vmul.f32 %v2435_v45, %v971_v59 }
0x1539   :  { %v982_v60 = vsel %vm978_vm4, %v2763_v34, %v973_v4 }
0x153a   :  { %1002 = vrot.lane.b32.xlu0 %v982_v60, %s2527_s3 }
0x15ac   :  { %v1003_v61 = vpop.permute.xlu0 %1002 }
0x15ad   :  { %2268 = vmatmul.mubr.msk.f32.vlgmr.msra.gmra.mxu1 %vm50_vm0, %v1003_v61 }
0x15ae   :  { %2282 = vmatpush3.msra.mxu1 %v2784_v36  ;;  %2289 = vmatprep.mubr.msk.f32.mxu1 %vm2525_vm1, %v2524_v3 }
0x15af   :  { %2283 = vmatprep.subr.mxu1 %v2524_v3 }
0x15b0   :  { %2284 = vmatpush3.msra.mxu1 %v2790_v54 }
0x15b1   :  { %2285 = vmatprep.subr.mxu1 %v2524_v3 }
0x15b2   :  { %2286 = vmatpush3.msra.mxu1 %v2799_v56 }
0x15b3   :  { %2287 = vmatprep.subr.mxu1 %v2524_v3 }
0x15b4   :  { %2288 = vmatpush3.msra.mxu1 %v2813_v58 }
0x15b5   :  { %2303 = vmatprep.subr.mxu1 %v2524_v3 }
0x166d   :  { %v2269_v10 = vpop.f32.mrf.mxu1 }
0x166e   :  { %v2845_v0 = vadd.f32 %v2269_v10, %v2043_v63 }
0x166f   :  { %v1074_v1 = vpop.f32.mrf.mxu1 }
0x1670   :  { %v2847_v5 = vadd.f32 %v2043_v63, %v1074_v1 }
0x1672   :  { %v1153_v6 = vadd.f32 %v1149_v8, %v2847_v5 }
0x1674   :  { %2438 = vtanh.f32 %v1153_v6  ;;  %v2046_v9 = vmul.f32 -1.442695, %v1153_v6 }
0x1676   :  { %2440 = vpow2.f32 %v2046_v9 }
0x1681   :  { %v2439_v7 = vpop.eup %2438 }
0x1682   :  { %1163 = vrot.lane.b32.xlu1 %v2439_v7, %s2526_s2 }
0x1683   :  { %v2441_v11 = vpop.eup %2440 }
0x1684   :  { %v1157_v12 = vadd.f32 1.0, %v2441_v11 }
0x1686   :  { %2442 = vrcp.f32 %v1157_v12 }
0x1693   :  { %v2443_v14 = vpop.eup %2442 }
0x1694   :  { %v1161_v18 = vmul.f32 0.0, %v2443_v14 }
0x16f4   :  { %v1164_v15 = vpop.permute.xlu1 %1163 }
0x16f5   :  { %v1166_v17 = vmul.f32 %v2443_v14, %v1164_v15 }
0x16f7   :  { %1168 = vrot.lane.b32.xlu0 %v1166_v17, %s2527_s3 }
0x1769   :  { %v1169_v19 = vpop.permute.xlu0 %1168 }
0x176a   :  { %v1171_v20 = vadd.f32 %v1169_v19, %v1161_v18 }
0x176c   :  { %2444 = vtanh.f32 %v1171_v20  ;;  %v1265_v35 = vrot.slane %v1171_v20, 6 }
0x1779   :  { %v2445_v21 = vpop.eup %2444 }
0x177a   :  { %1174 = vrot.lane.b32.xlu1 %v2445_v21, %s2526_s2 }
0x17ec   :  { %v1175_v22 = vpop.permute.xlu1 %1174 }
0x17ed   :  { %v1177_v23 = vmul.f32 %v2443_v14, %v1175_v22 }
0x17ef   :  { %1179 = vrot.lane.b32.xlu0 %v1177_v23, %s2527_s3 }
0x1861   :  { %v1180_v24 = vpop.permute.xlu0 %1179 }
0x1862   :  { %2290 = vmatmul.mubr.msk.f32.vlgmr.msra.gmra.mxu1 %vm50_vm0, %v1180_v24 }
0x1863   :  { %2304 = vmatpush3.msra.mxu1 %v2784_v36  ;;  %2311 = vmatprep.mubr.msk.f32.mxu1 %vm2525_vm1, %v2524_v3 }
0x1864   :  { %2305 = vmatprep.subr.mxu1 %v2524_v3 }
0x1865   :  { %2306 = vmatpush3.msra.mxu1 %v2790_v54 }
0x1866   :  { %2307 = vmatprep.subr.mxu1 %v2524_v3 }
0x1867   :  { %2308 = vmatpush3.msra.mxu1 %v2799_v56 }
0x1868   :  { %2309 = vmatprep.subr.mxu1 %v2524_v3 }
0x1869   :  { %2310 = vmatpush3.msra.mxu1 %v2813_v58 }
0x186a   :  { %2325 = vmatprep.subr.mxu1 %v2524_v3 }
0x1922   :  { %v1249_v25 = vpop.f32.mrf.mxu1 }
0x1923   :  { %v1254_v26 = vrot.slane %v1249_v25, 6 }
0x1924   :  { %v2291_v27 = vpop.f32.mrf.mxu1 }
0x1925   :  { %v1256_v28 = vadd.f32 %v1254_v26, %v2847_v5 }
0x1927   :  { %2446 = vtanh.f32 %v1256_v28  ;;  %v2048_v30 = vmul.f32 -1.442695, %v1256_v28 }
0x1929   :  { %2448 = vpow2.f32 %v2048_v30 }
0x1934   :  { %v2447_v29 = vpop.eup %2446 }
0x1935   :  { %1269 = vrot.lane.b32.xlu1 %v2447_v29, %s2526_s2 }
0x1936   :  { %v2449_v31 = vpop.eup %2448 }
0x1937   :  { %v1260_v32 = vadd.f32 1.0, %v2449_v31 }
0x1939   :  { %2450 = vrcp.f32 %v1260_v32 }
0x1946   :  { %v2451_v16 = vpop.eup %2450 }
0x1947   :  { %v1267_v37 = vmul.f32 %v2451_v16, %v1265_v35 }
0x19a7   :  { %v1270_v33 = vpop.permute.xlu1 %1269 }
0x19a8   :  { %v1272_v34 = vmul.f32 %v2451_v16, %v1270_v33 }
0x19aa   :  { %1274 = vrot.lane.b32.xlu0 %v1272_v34, %s2527_s3 }
0x1a1c   :  { %v1275_v38 = vpop.permute.xlu0 %1274 }
0x1a1d   :  { %v1277_v39 = vadd.f32 %v1275_v38, %v1267_v37 }
0x1a1f   :  { %2452 = vtanh.f32 %v1277_v39  ;;  %v1372_v57 = vrot.slane %v1277_v39, 6 }
0x1a2c   :  { %v2453_v40 = vpop.eup %2452 }
0x1a2d   :  { %1280 = vrot.lane.b32.xlu1 %v2453_v40, %s2526_s2 }
0x1a9f   :  { %v1281_v41 = vpop.permute.xlu1 %1280 }
0x1aa0   :  { %v1283_v42 = vmul.f32 %v2451_v16, %v1281_v41 }
0x1aa2   :  { %v1285_v43 = vrot.slane %v1283_v42, 2 }
0x1aa4   :  { %1286 = vrot.lane.b32.xlu0 %v1285_v43, %s2527_s3 }
0x1b16   :  { %v1287_v44 = vpop.permute.xlu0 %1286 }
0x1b17   :  { %2301 = vmatmul.mubr.msk.f32.vlgmr.msra.gmra.mxu0 %vm50_vm0, %v1287_v44 }
0x1b18   :  { %2315 = vmatpush3.msra.mxu0 %v2784_v36  ;;  %2322 = vmatprep.mubr.msk.f32.mxu0 %vm2525_vm1, %v2524_v3 }
0x1b19   :  { %2316 = vmatprep.subr.mxu0 %v2524_v3 }
0x1b1a   :  { %2317 = vmatpush3.msra.mxu0 %v2790_v54 }
0x1b1b   :  { %2318 = vmatprep.subr.mxu0 %v2524_v3 }
0x1b1c   :  { %2319 = vmatpush3.msra.mxu0 %v2799_v56 }
0x1b1d   :  { %2320 = vmatprep.subr.mxu0 %v2524_v3 }
0x1b1e   :  { %2321 = vmatpush3.msra.mxu0 %v2813_v58 }
0x1b1f   :  { %2336 = vmatprep.subr.mxu0 %v2524_v3 }
0x1bd7   :  { %v1356_v45 = vpop.f32.mrf.mxu0 }
0x1bd8   :  { %v1361_v46 = vrot.slane %v1356_v45, 4 }
0x1bd9   :  { %v2302_v47 = vpop.f32.mrf.mxu0 }
0x1bda   :  { %v1363_v48 = vadd.f32 %v1361_v46, %v2847_v5 }
0x1bdc   :  { %2454 = vtanh.f32 %v1363_v48  ;;  %v2050_v13 = vmul.f32 -1.442695, %v1363_v48 }
0x1bde   :  { %2456 = vpow2.f32 %v2050_v13 }
0x1be9   :  { %v2455_v49 = vpop.eup %2454 }
0x1bea   :  { %1376 = vrot.lane.b32.xlu1 %v2455_v49, %s2526_s2 }
0x1beb   :  { %v2457_v50 = vpop.eup %2456 }
0x1bec   :  { %v1367_v51 = vadd.f32 1.0, %v2457_v50 }
0x1bee   :  { %2458 = vrcp.f32 %v1367_v51 }
0x1bfb   :  { %v2459_v52 = vpop.eup %2458 }
0x1bfc   :  { %v1374_v2 = vmul.f32 %v2459_v52, %v1372_v57 }
0x1c5c   :  { %v1377_v53 = vpop.permute.xlu1 %1376 }
0x1c5d   :  { %v1379_v55 = vmul.f32 %v2459_v52, %v1377_v53 }
0x1c5f   :  { %1381 = vrot.lane.b32.xlu0 %v1379_v55, %s2527_s3 }
0x1cd1   :  { %v1382_v59 = vpop.permute.xlu0 %1381 }
0x1cd2   :  { %v1384_v4 = vadd.f32 %v1382_v59, %v1374_v2 }
0x1cd4   :  { %2460 = vtanh.f32 %v1384_v4  ;;  %v1479_v19 = vrot.slane %v1384_v4, 6 }
0x1ce1   :  { %v2461_v60 = vpop.eup %2460 }
0x1ce2   :  { %1387 = vrot.lane.b32.xlu1 %v2461_v60, %s2526_s2 }
0x1d54   :  { %v1388_v61 = vpop.permute.xlu1 %1387 }
0x1d55   :  { %v1390_v8 = vmul.f32 %v2459_v52, %v1388_v61 }
0x1d57   :  { %v1392_v62 = vrot.slane %v1390_v8, 4 }
0x1d59   :  { %1393 = vrot.lane.b32.xlu0 %v1392_v62, %s2527_s3 }
0x1dcb   :  { %v1394_v63 = vpop.permute.xlu0 %1393 }
0x1dcc   :  { %2312 = vmatmul.mubr.msk.f32.vlgmr.msra.gmra.mxu1 %vm50_vm0, %v1394_v63 }
0x1dcd   :  { %2326 = vmatpush3.msra.mxu1 %v2784_v36  ;;  %2333 = vmatprep.mubr.msk.f32.mxu1 %vm2525_vm1, %v2524_v3 }
0x1dce   :  { %2327 = vmatprep.subr.mxu1 %v2524_v3 }
0x1dcf   :  { %2328 = vmatpush3.msra.mxu1 %v2790_v54 }
0x1dd0   :  { %2329 = vmatprep.subr.mxu1 %v2524_v3 }
0x1dd1   :  { %2330 = vmatpush3.msra.mxu1 %v2799_v56 }
0x1dd2   :  { %2331 = vmatprep.subr.mxu1 %v2524_v3 }
0x1dd3   :  { %2332 = vmatpush3.msra.mxu1 %v2813_v58 }
0x1dd4   :  { %2347 = vmatprep.subr.mxu1 %v2524_v3 }
0x1e8c   :  { %v1463_v10 = vpop.f32.mrf.mxu1 }
0x1e8d   :  { %v1468_v1 = vrot.slane %v1463_v10, 2 }
0x1e8e   :  { %v2313_v6 = vpop.f32.mrf.mxu1 }
0x1e8f   :  { %v1470_v7 = vadd.f32 %v1468_v1, %v2847_v5 }
0x1e91   :  { %2462 = vtanh.f32 %v1470_v7  ;;  %v2052_v11 = vmul.f32 -1.442695, %v1470_v7 }
0x1e93   :  { %2464 = vpow2.f32 %v2052_v11 }
0x1e9e   :  { %v2463_v9 = vpop.eup %2462 }
0x1e9f   :  { %1483 = vrot.lane.b32.xlu1 %v2463_v9, %s2526_s2 }
0x1ea0   :  { %v2465_v12 = vpop.eup %2464 }
0x1ea1   :  { %v1474_v14 = vadd.f32 1.0, %v2465_v12 }
0x1ea3   :  { %2466 = vrcp.f32 %v1474_v14 }
0x1eb0   :  { %v2467_v15 = vpop.eup %2466 }
0x1eb1   :  { %v1481_v20 = vmul.f32 %v2467_v15, %v1479_v19 }
0x1f11   :  { %v1484_v17 = vpop.permute.xlu1 %1483 }
0x1f12   :  { %v1486_v18 = vmul.f32 %v2467_v15, %v1484_v17 }
0x1f14   :  { %1488 = vrot.lane.b32.xlu0 %v1486_v18, %s2527_s3 }
0x1f86   :  { %v1489_v21 = vpop.permute.xlu0 %1488 }
0x1f87   :  { %v1491_v22 = vadd.f32 %v1489_v21, %v1481_v20 }
0x1f89   :  { %2468 = vtanh.f32 %v1491_v22  ;;  %v1583_v37 = vrot.slane %v1491_v22, 6 }
0x1f96   :  { %v2469_v5 = vpop.eup %2468 }
0x1f97   :  { %1494 = vrot.lane.b32.xlu1 %v2469_v5, %s2526_s2 }
0x2009   :  { %v1495_v23 = vpop.permute.xlu1 %1494 }
0x200a   :  { %v1497_v24 = vmul.f32 %v2467_v15, %v1495_v23 }
0x200c   :  { %v1499_v25 = vrot.slane %v1497_v24, 6 }
0x200e   :  { %1500 = vrot.lane.b32.xlu0 %v1499_v25, %s2527_s3 }
0x2080   :  { %v1501_v26 = vpop.permute.xlu0 %1500 }
0x2081   :  { %2323 = vmatmul.mubr.msk.f32.vlgmr.msra.gmra.mxu0 %vm50_vm0, %v1501_v26 }
0x2082   :  { %2337 = vmatpush3.msra.mxu0 %v2784_v36  ;;  %2344 = vmatprep.mubr.msk.f32.mxu0 %vm2525_vm1, %v2524_v3 }
0x2083   :  { %2338 = vmatprep.subr.mxu0 %v2524_v3 }
0x2084   :  { %2339 = vmatpush3.msra.mxu0 %v2790_v54 }
0x2085   :  { %2340 = vmatprep.subr.mxu0 %v2524_v3 }
0x2086   :  { %2341 = vmatpush3.msra.mxu0 %v2799_v56 }
0x2087   :  { %2342 = vmatprep.subr.mxu0 %v2524_v3 }
0x2088   :  { %2343 = vmatpush3.msra.mxu0 %v2813_v58 }
0x2089   :  { %2358 = vmatprep.subr.mxu0 %v2524_v3 }
0x2141   :  { %v1570_v27 = vpop.f32.mrf.mxu0 }
0x2142   :  { %v1574_v28 = vadd.f32 %v1570_v27, %v2845_v0 }
0x2143   :  { %v2324_v29 = vpop.f32.mrf.mxu0 }
0x2144   :  { %2470 = vtanh.f32 %v1574_v28  ;;  %v2054_v31 = vmul.f32 -1.442695, %v1574_v28 }
0x2146   :  { %2472 = vpow2.f32 %v2054_v31 }
0x2151   :  { %v2471_v30 = vpop.eup %2470 }
0x2152   :  { %1587 = vrot.lane.b32.xlu1 %v2471_v30, %s2526_s2 }
0x2153   :  { %v2473_v32 = vpop.eup %2472 }
0x2154   :  { %v1578_v16 = vadd.f32 1.0, %v2473_v32 }
0x2156   :  { %2474 = vrcp.f32 %v1578_v16 }
0x2163   :  { %v2475_v33 = vpop.eup %2474 }
0x2164   :  { %v1585_v38 = vmul.f32 %v2475_v33, %v1583_v37 }
0x21c4   :  { %v1588_v34 = vpop.permute.xlu1 %1587 }
0x21c5   :  { %v1590_v35 = vmul.f32 %v2475_v33, %v1588_v34 }
0x21c7   :  { %1592 = vrot.lane.b32.xlu0 %v1590_v35, %s2527_s3 }
0x2239   :  { %v1593_v39 = vpop.permute.xlu0 %1592 }
0x223a   :  { %v1595_v40 = vadd.f32 %v1593_v39, %v1585_v38  ;;  %v1924_v38 = vld [vmem:[%s2976_s7 + $0x10] sm:$0xff]  ;;  %v1923_v39 = vld [vmem:[%s2976_s7 + $0x8] sm:$0xff] }
0x223c   :  { %2476 = vtanh.f32 %v1595_v40 }
0x2249   :  { %v2477_v41 = vpop.eup %2476 }
0x224a   :  { %1598 = vrot.lane.b32.xlu1 %v2477_v41, %s2526_s2 }
0x22bc   :  { %v1599_v42 = vpop.permute.xlu1 %1598 }
0x22bd   :  { %v1601_v43 = vmul.f32 %v2475_v33, %v1599_v42 }
0x22bf   :  { %1603 = vrot.lane.b32.xlu0 %v1601_v43, %s2527_s3 }
0x2331   :  { %v1604_v44 = vpop.permute.xlu0 %1603 }
0x2332   :  { %2334 = vmatmul.mubr.msk.f32.vlgmr.msra.gmra.mxu1 %vm50_vm0, %v1604_v44 }
0x2333   :  { %2348 = vmatpush3.msra.mxu1 %v2784_v36  ;;  %2355 = vmatprep.mubr.msk.f32.mxu1 %vm2525_vm1, %v2524_v3 }
0x2334   :  { %2349 = vmatprep.subr.mxu1 %v2524_v3 }
0x2335   :  { %2350 = vmatpush3.msra.mxu1 %v2790_v54 }
0x2336   :  { %2351 = vmatprep.subr.mxu1 %v2524_v3 }
0x2337   :  { %2352 = vmatpush3.msra.mxu1 %v2799_v56 }
0x2338   :  { %2353 = vmatprep.subr.mxu1 %v2524_v3 }
0x2339   :  { %2354 = vmatpush3.msra.mxu1 %v2813_v58  ;;  %v1689_v58 = vrot.slane %v1595_v40, 6  ;;  %v1922_v40 = vld [vmem:[%s2976_s7] sm:$0xff] }
0x23f2   :  { %v1673_v45 = vpop.f32.mrf.mxu1 }
0x23f3   :  { %v1678_v46 = vrot.slane %v1673_v45, 6 }
0x23f4   :  { %v2335_v47 = vpop.f32.mrf.mxu1 }
0x23f5   :  { %v1680_v36 = vadd.f32 %v1678_v46, %v2845_v0  ;;  %v2061_v46 = vld [vmem:[%s2977_s8] ss:$0 sm:$0xff] }
0x23f7   :  { %2478 = vtanh.f32 %v1680_v36  ;;  %v2056_v49 = vmul.f32 -1.442695, %v1680_v36 }
0x23f9   :  { %2480 = vpow2.f32 %v2056_v49 }
0x2404   :  { %v2479_v48 = vpop.eup %2478 }
0x2405   :  { %1693 = vrot.lane.b32.xlu1 %v2479_v48, %s2526_s2 }
0x2406   :  { %v2481_v54 = vpop.eup %2480 }
0x2407   :  { %v1684_v13 = vadd.f32 1.0, %v2481_v54 }
0x2409   :  { %2482 = vrcp.f32 %v1684_v13 }
0x2416   :  { %v2483_v50 = vpop.eup %2482 }
0x2417   :  { %v1691_v52 = vmul.f32 %v2483_v50, %v1689_v58 }
0x2477   :  { %v1694_v56 = vpop.permute.xlu1 %1693 }
0x2478   :  { %v1696_v51 = vmul.f32 %v2483_v50, %v1694_v56 }
0x247a   :  { %1698 = vrot.lane.b32.xlu0 %v1696_v51, %s2527_s3 }
0x24ec   :  { %v1699_v53 = vpop.permute.xlu0 %1698 }
0x24ed   :  { %v1701_v55 = vadd.f32 %v1699_v53, %v1691_v52 }
0x24ef   :  { %2484 = vtanh.f32 %v1701_v55  ;;  %v1796_v14 = vrot.slane %v1701_v55, 6 }
0x24fc   :  { %v2485_v57 = vpop.eup %2484 }
0x24fd   :  { %1704 = vrot.lane.b32.xlu1 %v2485_v57, %s2526_s2 }
0x256f   :  { %v1705_v2 = vpop.permute.xlu1 %1704 }
0x2570   :  { %v1707_v59 = vmul.f32 %v2483_v50, %v1705_v2 }
0x2572   :  { %v1709_v4 = vrot.slane %v1707_v59, 2 }
0x2574   :  { %1710 = vrot.lane.b32.xlu0 %v1709_v4, %s2527_s3 }
0x25e6   :  { %v1711_v60 = vpop.permute.xlu0 %1710 }
0x25e7   :  { %2345 = vmatmul.mubr.msk.f32.vlgmr.msra.gmra.mxu0 %vm50_vm0, %v1711_v60 }
0x25e8   :  { %2366 = vmatprep.mubr.msk.f32.mxu0 %vm2525_vm1, %v2524_v3 }
0x26a7   :  { %v1780_v61 = vpop.f32.mrf.mxu0 }
0x26a8   :  { %v1785_v8 = vrot.slane %v1780_v61, 4 }
0x26a9   :  { %v2346_v62 = vpop.f32.mrf.mxu0 }
0x26aa   :  { %v1787_v63 = vadd.f32 %v1785_v8, %v2845_v0 }
0x26ac   :  { %2486 = vtanh.f32 %v1787_v63  ;;  %v2058_v1 = vmul.f32 -1.442695, %v1787_v63 }
0x26ae   :  { %2488 = vpow2.f32 %v2058_v1 }
0x26b9   :  { %v2487_v10 = vpop.eup %2486 }
0x26ba   :  { %1800 = vrot.lane.b32.xlu1 %v2487_v10, %s2526_s2 }
0x26bb   :  { %v2489_v6 = vpop.eup %2488 }
0x26bc   :  { %v1791_v7 = vadd.f32 1.0, %v2489_v6 }
0x26be   :  { %2490 = vrcp.f32 %v1791_v7 }
0x26cb   :  { %v2491_v9 = vpop.eup %2490 }
0x26cc   :  { %v1798_v15 = vmul.f32 %v2491_v9, %v1796_v14 }
0x272c   :  { %v1801_v11 = vpop.permute.xlu1 %1800 }
0x272d   :  { %v1803_v12 = vmul.f32 %v2491_v9, %v1801_v11 }
0x272f   :  { %1805 = vrot.lane.b32.xlu0 %v1803_v12, %s2527_s3 }
0x27a1   :  { %v1806_v17 = vpop.permute.xlu0 %1805 }
0x27a2   :  { %v1808_v18 = vadd.f32 %v1806_v17, %v1798_v15 }
0x27a4   :  { %2492 = vtanh.f32 %v1808_v18  ;;  %v1903_v33 = vrot.slane %v1808_v18, 6 }
0x27b1   :  { %v2493_v19 = vpop.eup %2492 }
0x27b2   :  { %1811 = vrot.lane.b32.xlu1 %v2493_v19, %s2526_s2 }
0x2824   :  { %v1812_v20 = vpop.permute.xlu1 %1811 }
0x2825   :  { %v1814_v21 = vmul.f32 %v2491_v9, %v1812_v20 }
0x2827   :  { %v1816_v22 = vrot.slane %v1814_v21, 4 }
0x2829   :  { %1817 = vrot.lane.b32.xlu0 %v1816_v22, %s2527_s3 }
0x289b   :  { %v1818_v5 = vpop.permute.xlu0 %1817 }
0x289c   :  { %2356 = vmatmul.mubr.msk.f32.vlgmr.msra.gmra.mxu1 %vm50_vm0, %v1818_v5 }
0x295c   :  { %v1887_v23 = vpop.f32.mrf.mxu1 }
0x295d   :  { %v1892_v24 = vrot.slane %v1887_v23, 2 }
0x295e   :  { %v2357_v25 = vpop.f32.mrf.mxu1 }
0x295f   :  { %v1894_v26 = vadd.f32 %v1892_v24, %v2845_v0  ;;  %v1925_v0 = vld [vmem:[%s2976_s7 + $0x18] sm:$0xff]  ;;  %s2528_s7 = smov [#allocation2]  }
0x2960   :  { %2359 = vmatpush3.msra.mxu0 %v1925_v0  ;;  %s2017_s10 = sshll.u32 %s2528_s7, 4  ;;  %s2018_s10 = int_to_ptr.vmem [resolvable:$true] %s2017_s10 }
0x2961   :  { %2494 = vtanh.f32 %v1894_v26  ;;  %v2060_v28 = vmul.f32 -1.442695, %v1894_v26  ;;  %2360 = vmatprep.subr.mxu0 %v2524_v3  ;;  %p2507_p1 = scmp.lt.s32.totalorder %s2018_s10, %s2018_s10 }
0x2962   :  { %2361 = vmatpush3.msra.mxu0 %v1924_v38 }
0x2963   :  { %2496 = vpow2.f32 %v2060_v28  ;;  %2362 = vmatprep.subr.mxu0 %v2524_v3 }
0x2964   :  { %2363 = vmatpush3.msra.mxu0 %v1923_v39 }
0x2965   :  { %2364 = vmatprep.subr.mxu0 %v2524_v3 }
0x2966   :  { %2365 = vmatpush3.msra.mxu0 %v1922_v40 }
0x296e   :  { %v2495_v27 = vpop.eup %2494 }
0x296f   :  { %1907 = vrot.lane.b32.xlu1 %v2495_v27, %s2526_s2 }
0x2970   :  { %v2497_v29 = vpop.eup %2496 }
0x2971   :  { %v1898_v30 = vadd.f32 1.0, %v2497_v29 }
0x2973   :  { %2498 = vrcp.f32 %v1898_v30 }
0x2980   :  { %v2499_v31 = vpop.eup %2498 }
0x2981   :  { %v1905_v34 = vmul.f32 %v2499_v31, %v1903_v33 }
0x29e1   :  { %v1908_v32 = vpop.permute.xlu1 %1907 }
0x29e2   :  { %v1910_v16 = vmul.f32 %v2499_v31, %v1908_v32 }
0x29e4   :  { %1912 = vrot.lane.b32.xlu0 %v1910_v16, %s2527_s3 }
0x2a56   :  { %v1913_v35 = vpop.permute.xlu0 %1912 }
0x2a57   :  { %v1915_v37 = vadd.f32 %v1913_v35, %v1905_v34 }
0x2a59   :  { %2500 = vtanh.f32 %v1915_v37 }
0x2a66   :  { %v2501_v41 = vpop.eup %2500 }
0x2a67   :  { %1918 = vrot.lane.b32.xlu1 %v2501_v41, %s2526_s2  ;;  %s2502_s2 = scalar_lea.vmem %s2018_s10, 32 }
0x2a68   :  { %p2503_p0 = scmp.ne.s32.totalorder %s2018_s10, %s2502_s2  ;;  %p2508_p2 = scmp.lt.s32.totalorder %s2502_s2, %s2502_s2 }
0x2a6a   :  { %p2509_p3 = por %p2508_p2, %p2507_p1 }
0x2a6c   :  { %p2510_p4 = pnand %p2509_p3, %p2503_p0 }
0x2ad9   :  { %v1919_v42 = vpop.permute.xlu1 %1918 }
0x2ada   :  { %v1921_v43 = vmul.f32 %v2499_v31, %v1919_v42 }
0x2adc   :  { %v1934_v44 = vrot.slane %v1921_v43, 6 }
0x2ade   :  { %1935 = vrot.lane.b32.xlu0 %v1934_v44, %s2527_s3 }
0x2b50   :  { %v1936_v45 = vpop.permute.xlu0 %1935 }
0x2b51   :  { %2367 = vmatmul.mubr.msk.f32.vlgmr.msra.gmra.mxu0 %vm50_vm0, %v1936_v45 }
0x2c11   :  { %v2005_v47 = vpop.f32.mrf.mxu0 }
0x2c12   :  { %v2006_v3 = vadd.f32 %v2061_v46, %v2005_v47 }
0x2c13   :  { %v2368_v36 = vpop.f32.mrf.mxu0 }
0x2c14   :  { %2010 = vst.msk [vmem:[#allocation2] sm:$0x3] %vm2009_vm5, %v2006_v3 }
0x2c15   :  { %2513 = shalt.err (!%p2510_p4)
}
0x2c16   :  { %2020 = dma.vmem_to_hbm [thread:$0]  %s2018_s10, 32, %s2978_s9, [#allocation3]  }
0x2c17   :  { %2522 = dma.done.wait [#allocation3], 32  }
0x2c18   :  { %2523 = vsyncadd [#allocation3], 4294967264 }
0x2c19   :  { %2024 = vsyncpa [#allocation3], 1 }

</bundles_post_ra>
